<compile_context>
chip_gen: v5e
topology: v5e:2x2
jax: 0.10.0
libtpu: 0.0.40
codegen_flags: <defaults>
</compile_context>

<pallas_src>
import math

import jax
import jax.numpy as jnp
from jax.experimental import pallas as pl
from jax.experimental.pallas import tpu as pltpu

N_OBS = 3
N_ACTIONS = 1
NETWORK_SIZE = 256
FC1_DIMS = NETWORK_SIZE * 3 // 4   # 192
FC2_DIMS = NETWORK_SIZE * 3 // 4   # 192
HID = 256                          # hidden dims zero-padded 192 -> 256 (exact)
K_IN = N_OBS + N_ACTIONS           # 4
K_IN_PAD = 8                       # fc1 input dim zero-padded 4 -> 8 (exact)
LEAKY_SLOPE = 0.01                 # F.leaky_relu default negative_slope
MAX_BATCH_TILE = 2048              # lane-dense batch-tile cap (columns / step)
MIN_BATCH_TILE = 256


def _leaky_relu(x):
    # max(x, a*x) == leaky_relu(x) for 0 < a < 1: 2 VPU ops instead of 3.
    return jnp.maximum(x, LEAKY_SLOPE * x)


def critic_kernel(xT_ref, w1_ref, b1_ref, w2_ref, b2_ref, w3_ref, b3_ref, o_ref):
    # ---- Layer 1 (fc1): tiny-K MXU matmul, f32 operands / f32 accumulation. ----
    h1 = _leaky_relu(
        jnp.dot(w1_ref[...], xT_ref[...], preferred_element_type=jnp.float32)
        + b1_ref[...])                                            # (HID, TB) f32

    # ---- Layer 2 (fc2): aligned 256x256 bf16 MXU matmul, f32 accumulation. ----
    h2 = _leaky_relu(
        jnp.dot(w2_ref[...], h1.astype(jnp.bfloat16),
                preferred_element_type=jnp.float32)
        + b2_ref[...])                                            # (HID, TB) f32

    # ---- Layer 3 (q1, 256 -> 1): VPU multiply + sublane reduce (no N=1 MXU). ----
    q = jnp.sum(w3_ref[...] * h2, axis=0, keepdims=True) + b3_ref[...]
    o_ref[...] = q.astype(o_ref.dtype)                            # (1, TB) lane-dense


def _pick_batch_tile(batch):
    """Largest tile (capped at MAX_BATCH_TILE) that still yields >= 2 grid steps
    when the batch allows it, so both v7x TensorCores get work."""
    per_core = pl.cdiv(batch, 2)
    tile = pl.cdiv(per_core, MIN_BATCH_TILE) * MIN_BATCH_TILE
    return int(max(MIN_BATCH_TILE, min(MAX_BATCH_TILE, tile)))


def critic_forward(state, action, params):
    """state: (B, N_OBS), action: (B, N_ACTIONS) -> q: (B, 1)."""
    w1, b1, w2, b2, w3, b3 = params
    B = state.shape[0]
    batch_tile = _pick_batch_tile(B)
    num_tiles = pl.cdiv(B, batch_tile)
    Bp = num_tiles * batch_tile

    # Feature-major input: concat state/action, zero-pad K 4->8 and batch B->Bp.
    # Padded columns/rows are zero and are sliced away / contribute nothing.
    x = jnp.concatenate(
        [state.astype(jnp.float32), action.astype(jnp.float32)], axis=1)   # (B, 4)
    xT = jnp.pad(x, ((0, Bp - B), (0, K_IN_PAD - K_IN))).T                  # (8, Bp)

    const = lambda i: (0, 0)   # weights: same block every step -> stay resident
    tile = lambda i: (0, i)    # batch-tiled x / q

    qT = pl.pallas_call(
        critic_kernel,
        out_shape=jax.ShapeDtypeStruct((1, Bp), jnp.float32),
        grid_spec=pltpu.PrefetchScalarGridSpec(
            num_scalar_prefetch=0,
            grid=(num_tiles,),
            in_specs=[
                pl.BlockSpec((K_IN_PAD, batch_tile), tile),   # x^T
                pl.BlockSpec((HID, K_IN_PAD), const),         # fc1.W (padded)
                pl.BlockSpec((HID, 1), const),                # fc1.b
                pl.BlockSpec((HID, HID), const),              # fc2.W (bf16)
                pl.BlockSpec((HID, 1), const),                # fc2.b
                pl.BlockSpec((HID, 1), const),                # q1.W^T (column)
                pl.BlockSpec((1, 1), const),                  # q1.b
            ],
            out_specs=pl.BlockSpec((1, batch_tile), tile),    # q^T, lane-dense
        ),
        compiler_params=pltpu.CompilerParams(
            dimension_semantics=("parallel",),
            vmem_limit_bytes=32 * 1024 * 1024),
    )(xT, w1, b1, w2, b2, w3, b3)

    # (1, B) -> (B, 1): leading dim is 1, so this is layout-free.
    return qT[:, :B].T


def init_params(key):
    """PyTorch-layout params with nn.Linear's U(-1/sqrt(fan_in), 1/sqrt(fan_in))."""
    ks = jax.random.split(key, 6)
    in1 = N_OBS + N_ACTIONS

    def uinit(k, shape, fan_in):
        bound = 1.0 / math.sqrt(fan_in)
        return jax.random.uniform(k, shape, jnp.float32, -bound, bound)

    fc1_w = uinit(ks[0], (FC1_DIMS, in1), in1)            # (192, 4)
    fc1_b = uinit(ks[1], (FC1_DIMS,), in1)
    fc2_w = uinit(ks[2], (FC2_DIMS, FC1_DIMS), FC1_DIMS)  # (192, 192)
    fc2_b = uinit(ks[3], (FC2_DIMS,), FC1_DIMS)
    q1_w = uinit(ks[4], (1, FC2_DIMS), FC2_DIMS)          # (1, 192)
    q1_b = uinit(ks[5], (1,), FC2_DIMS)
    return (fc1_w, fc1_b, fc2_w, fc2_b, q1_w, q1_b)


def prepare_params(raw):
    """Zero-pad hidden dims 192 -> 256 and fc1's input 4 -> 8; shape for kernel.

    Padding is mathematically exact: padded units/inputs have zero weights and
    bias, so they produce leaky_relu(0) = 0 and contribute nothing downstream.
    fc2's weights are stored in bfloat16 (MXU operands); all biases and the
    small layers stay f32.
    """
    fc1_w, fc1_b, fc2_w, fc2_b, q1_w, q1_b = raw
    ph = HID - FC1_DIMS
    w1 = jnp.pad(fc1_w, ((0, ph), (0, K_IN_PAD - K_IN)))   # (HID, K_IN_PAD) f32
    b1 = jnp.pad(fc1_b, (0, ph)).reshape(HID, 1)
    w2 = jnp.pad(fc2_w, ((0, ph), (0, ph))).astype(jnp.bfloat16)   # (HID, HID) bf16
    b2 = jnp.pad(fc2_b, (0, ph)).reshape(HID, 1)
    w3 = jnp.pad(q1_w, ((0, 0), (0, ph))).T                # (HID, 1) f32 column
    b3 = q1_b.reshape(1, 1)
    return (w1, b1, w2, b2, w3, b3)


def critic_reference(state, action, raw):
    """Pure-JAX f32 reference for the PyTorch forward (precision pinned HIGHEST)."""
    fc1_w, fc1_b, fc2_w, fc2_b, q1_w, q1_b = raw
    hp = jax.lax.Precision.HIGHEST
    x = jnp.concatenate([state, action], axis=1)                          # (B, 4)
    h1 = _leaky_relu(jnp.dot(x, fc1_w.T, precision=hp) + fc1_b)
    h2 = _leaky_relu(jnp.dot(h1, fc2_w.T, precision=hp) + fc2_b)
    return jnp.dot(h2, q1_w.T, precision=hp) + q1_b                       # (B, 1)


if __name__ == "__main__":
    key = jax.random.PRNGKey(0)
    k_params, k_s1, k_a1, k_s2, k_a2 = jax.random.split(key, 5)

    raw = init_params(k_params)
    params = prepare_params(raw)

    # Kernel uses bf16 fc2 weights/activations on the MXU (f32 accumulation), so
    # agreement with the pure-f32 reference is ~1e-2 relative.
    TOL = dict(atol=2e-2, rtol=2e-2)

    # Small batch: single grid step, batch padded up to one lane-dense tile.
    B = 8
    state = jax.random.normal(k_s1, (B, N_OBS), jnp.float32)
    action = jax.random.normal(k_a1, (B, N_ACTIONS), jnp.float32)
    q = jax.block_until_ready(critic_forward(state, action, params))
    q_ref = critic_reference(state, action, raw)
    assert q.shape == (B, 1), q.shape
    assert jnp.allclose(q, q_ref, **TOL), (q, q_ref)

    # Larger batch: multi-step grid (exercises both v7x cores) + ragged last tile.
    B2 = 300
    state2 = jax.random.normal(k_s2, (B2, N_OBS), jnp.float32)
    action2 = jax.random.normal(k_a2, (B2, N_ACTIONS), jnp.float32)
    q2 = jax.block_until_ready(critic_forward(state2, action2, params))
    q2_ref = critic_reference(state2, action2, raw)
    assert q2.shape == (B2, 1), q2.shape
    assert jnp.allclose(q2, q2_ref, **TOL), (q2, q2_ref)

    print("KERNEL_OK")
</pallas_src>

<mosaic_0001>
module attributes {stable_mosaic.version = 11 : i64} {
  func.func @critic_kernel(%arg0: i32, %arg1: memref<8x256xf32, #tpu.memory_space<vmem>>, %arg2: memref<256x8xf32, #tpu.memory_space<vmem>>, %arg3: memref<256x1xf32, #tpu.memory_space<vmem>>, %arg4: memref<256x256xbf16, #tpu.memory_space<vmem>>, %arg5: memref<256x1xf32, #tpu.memory_space<vmem>>, %arg6: memref<256x1xf32, #tpu.memory_space<vmem>>, %arg7: memref<1x1xf32, #tpu.memory_space<vmem>>, %arg8: memref<1x256xf32, #tpu.memory_space<vmem>>) attributes {dimension_semantics = [#tpu.dimension_semantics<parallel>], iteration_bounds = array<i64: 1>, scalar_prefetch = 0 : i64, scratch_operands = 0 : i64, tpu.core_type = #tpu.core_type<tc>, window_params = [{transform_indices = @transform_0, window_bounds = array<i64: 8, 256>}, {pipeline_mode = #tpu.pipeline_mode<synchronous>, transform_indices = @transform_1, window_bounds = array<i64: 256, 8>}, {pipeline_mode = #tpu.pipeline_mode<synchronous>, transform_indices = @transform_2, window_bounds = array<i64: 256, 1>}, {pipeline_mode = #tpu.pipeline_mode<synchronous>, transform_indices = @transform_3, window_bounds = array<i64: 256, 256>}, {pipeline_mode = #tpu.pipeline_mode<synchronous>, transform_indices = @transform_4, window_bounds = array<i64: 256, 1>}, {pipeline_mode = #tpu.pipeline_mode<synchronous>, transform_indices = @transform_5, window_bounds = array<i64: 256, 1>}, {pipeline_mode = #tpu.pipeline_mode<synchronous>, transform_indices = @transform_6, window_bounds = array<i64: 1, 1>}, {transform_indices = @transform_7, window_bounds = array<i64: 1, 256>}]} {
    %c0 = arith.constant 0 : index
    %c0_0 = arith.constant 0 : index
    %0 = vector.load %arg2[%c0, %c0_0] : memref<256x8xf32, #tpu.memory_space<vmem>>, vector<256x8xf32>
    %c0_1 = arith.constant 0 : index
    %c0_2 = arith.constant 0 : index
    %1 = vector.load %arg1[%c0_1, %c0_2] : memref<8x256xf32, #tpu.memory_space<vmem>>, vector<8x256xf32>
    %cst = arith.constant dense<0.000000e+00> : vector<256x256xf32>
    %2 = tpu.matmul %0, %1, %cst {dimension_numbers = #tpu.dot_dimension_numbers<[1], [0], [0], [1], [0, 0, 1, 1], [], []>} : vector<256x8xf32>, vector<8x256xf32>, vector<256x256xf32> -> vector<256x256xf32>
    %c0_3 = arith.constant 0 : index
    %c0_4 = arith.constant 0 : index
    %3 = vector.load %arg3[%c0_3, %c0_4] : memref<256x1xf32, #tpu.memory_space<vmem>>, vector<256x1xf32>
    %4 = vector.broadcast %3 : vector<256x1xf32> to vector<256x256xf32>
    %5 = arith.addf %2, %4 : vector<256x256xf32>
    %cst_5 = arith.constant 0.00999999977 : f32
    %6 = vector.broadcast %cst_5 : f32 to vector<256x256xf32>
    %7 = arith.mulf %6, %5 : vector<256x256xf32>
    %8 = arith.maximumf %5, %7 : vector<256x256xf32>
    %c0_6 = arith.constant 0 : index
    %c0_7 = arith.constant 0 : index
    %9 = vector.load %arg4[%c0_6, %c0_7] : memref<256x256xbf16, #tpu.memory_space<vmem>>, vector<256x256xbf16>
    %10 = arith.truncf %8 : vector<256x256xf32> to vector<256x256xbf16>
    %cst_8 = arith.constant dense<0.000000e+00> : vector<256x256xf32>
    %11 = tpu.matmul %9, %10, %cst_8 {dimension_numbers = #tpu.dot_dimension_numbers<[1], [0], [0], [1], [0, 0, 1, 1], [], []>} : vector<256x256xbf16>, vector<256x256xbf16>, vector<256x256xf32> -> vector<256x256xf32>
    %c0_9 = arith.constant 0 : index
    %c0_10 = arith.constant 0 : index
    %12 = vector.load %arg5[%c0_9, %c0_10] : memref<256x1xf32, #tpu.memory_space<vmem>>, vector<256x1xf32>
    %13 = vector.broadcast %12 : vector<256x1xf32> to vector<256x256xf32>
    %14 = arith.addf %11, %13 : vector<256x256xf32>
    %cst_11 = arith.constant 0.00999999977 : f32
    %15 = vector.broadcast %cst_11 : f32 to vector<256x256xf32>
    %16 = arith.mulf %15, %14 : vector<256x256xf32>
    %17 = arith.maximumf %14, %16 : vector<256x256xf32>
    %c0_12 = arith.constant 0 : index
    %c0_13 = arith.constant 0 : index
    %18 = vector.load %arg6[%c0_12, %c0_13] : memref<256x1xf32, #tpu.memory_space<vmem>>, vector<256x1xf32>
    %19 = vector.broadcast %18 : vector<256x1xf32> to vector<256x256xf32>
    %20 = arith.mulf %19, %17 : vector<256x256xf32>
    %cst_14 = arith.constant dense<0.000000e+00> : vector<256xf32>
    %21 = vector.multi_reduction <add>, %20, %cst_14 [0] : vector<256x256xf32> to vector<256xf32>
    %22 = vector.shape_cast %21 : vector<256xf32> to vector<1x256xf32>
    %c0_15 = arith.constant 0 : index
    %c0_16 = arith.constant 0 : index
    %23 = vector.load %arg7[%c0_15, %c0_16] : memref<1x1xf32, #tpu.memory_space<vmem>>, vector<1x1xf32>
    %24 = vector.broadcast %23 : vector<1x1xf32> to vector<1x256xf32>
    %25 = arith.addf %22, %24 : vector<1x256xf32>
    %c0_17 = arith.constant 0 : index
    %c0_18 = arith.constant 0 : index
    %26 = vector.load %arg8[%c0_17, %c0_18] : memref<1x256xf32, #tpu.memory_space<vmem>>, vector<1x256xf32>
    tpu.vector_store %arg8[%c0_17, %c0_18], %25 {strides = array<i32>} : memref<1x256xf32, #tpu.memory_space<vmem>>, vector<1x256xf32>,
    return
  }
  func.func @transform_0(%arg0: i32) -> (i32, i32) {
    %c0_i32 = arith.constant 0 : i32
    %c0_i32_0 = arith.constant 0 : i32
    return %c0_i32, %arg0 : i32, i32
  }
  func.func @transform_1(%arg0: i32) -> (i32, i32) {
    %c0_i32 = arith.constant 0 : i32
    %c0_i32_0 = arith.constant 0 : i32
    %c0_i32_1 = arith.constant 0 : i32
    return %c0_i32, %c0_i32_0 : i32, i32
  }
  func.func @transform_2(%arg0: i32) -> (i32, i32) {
    %c0_i32 = arith.constant 0 : i32
    %c0_i32_0 = arith.constant 0 : i32
    %c0_i32_1 = arith.constant 0 : i32
    return %c0_i32, %c0_i32_0 : i32, i32
  }
  func.func @transform_3(%arg0: i32) -> (i32, i32) {
    %c0_i32 = arith.constant 0 : i32
    %c0_i32_0 = arith.constant 0 : i32
    %c0_i32_1 = arith.constant 0 : i32
    return %c0_i32, %c0_i32_0 : i32, i32
  }
  func.func @transform_4(%arg0: i32) -> (i32, i32) {
    %c0_i32 = arith.constant 0 : i32
    %c0_i32_0 = arith.constant 0 : i32
    %c0_i32_1 = arith.constant 0 : i32
    return %c0_i32, %c0_i32_0 : i32, i32
  }
  func.func @transform_5(%arg0: i32) -> (i32, i32) {
    %c0_i32 = arith.constant 0 : i32
    %c0_i32_0 = arith.constant 0 : i32
    %c0_i32_1 = arith.constant 0 : i32
    return %c0_i32, %c0_i32_0 : i32, i32
  }
  func.func @transform_6(%arg0: i32) -> (i32, i32) {
    %c0_i32 = arith.constant 0 : i32
    %c0_i32_0 = arith.constant 0 : i32
    %c0_i32_1 = arith.constant 0 : i32
    return %c0_i32, %c0_i32_0 : i32, i32
  }
  func.func @transform_7(%arg0: i32) -> (i32, i32) {
    %c0_i32 = arith.constant 0 : i32
    %c0_i32_0 = arith.constant 0 : i32
    return %c0_i32, %arg0 : i32, i32
  }
}

</mosaic_0001>

<bundles_post_ra>
// kernel: tpu_custom_call.1
= control target key start
LH: loop header
LB: loop body
LE: loop exit
PB: predicated region body
PF: predicated region fallthrough
CT: control target
= control target key end

     0   :  { %s3512_s0 = inlined_call_operand.vmem [shape: f32[8,256], index: 0, kind: input, shape index: {}]   ;;  %s3513_s1 = inlined_call_operand.vmem [shape: f32[256,8], index: 1, kind: input, shape index: {}]   ;;  %s3514_s2 = inlined_call_operand.vmem [shape: f32[256,1], index: 2, kind: input, shape index: {}]   ;;  %s3515_s3 = inlined_call_operand.vmem [shape: bf16[256,256], index: 3, kind: input, shape index: {}]   ;;  %s3516_s4 = inlined_call_operand.vmem [shape: f32[256,1], index: 4, kind: input, shape index: {}]   ;;  %s3517_s5 = inlined_call_operand.vmem [shape: f32[256,1], index: 5, kind: input, shape index: {}]   ;;  %s3518_s6 = inlined_call_operand.<no memory space> [shape: f32[1,1], index: 6, kind: input, shape index: {}]   ;;  %s3519_s7 = inlined_call_operand.hbm [shape: f32[1,256], index: 7, kind: output, shape index: {}]  }
   0x1   :  { %v12_v0 = vstv %s3518_s6 }
   0x2   :  { %13 = vst [vmem:[#allocation2] sm:$0x1] %v12_v0 }
   0x3   :  { %v61_v1 = vld [vmem:[%s3512_s0] sm:$0xff]  ;;  %v62_v2 = vld [vmem:[%s3512_s0 + $0x8] sm:$0xff]  ;;  %v2229_v3 = vmov 0   ;;  %v65_v5 = vld [vmem:[%s3514_s2 + $0x10] sm:$0xff]  ;;  %vm255_vm0 = vcmask 64512  }
   0x4   :  { %2202 = vset.pattern.permute.xlu2 %v2229_v3  ;;  %2201 = vset.pattern.permute.xlu1 %v2229_v3  ;;  %v67_v4 = vld [vmem:[%s3514_s2 + $0x20] sm:$0xff]  ;;  %v46_v8 = vld [vmem:[%s3513_s1 + $0x88] sm:$0xff] }
   0x5   :  { %2200 = vset.pattern.permute.xlu0 %v2229_v3  ;;  %367 = vmatpush.msra.mxu0 %v61_v1  ;;  %v63_v6 = vld [vmem:[%s3514_s2] sm:$0xff]  ;;  %v68_v10 = vld [vmem:[%s3514_s2 + $0x28] sm:$0xff] }
   0x6   :  { %2196 = vmatpush.msra.mxu2 %v61_v1  ;;  %480 = vmatpush.msra.mxu1 %v62_v2  ;;  %v29_v7 = vld [vmem:[%s3513_s1] sm:$0xff] }
   0x7   :  { %2197 = vmatpush.msra.mxu3 %v62_v2  ;;  %117 = vperm.xlu2 %2202, %v67_v4   ;;  %v2298_v9 = vld [vmem:[%s3513_s1 + $0x80] sm:$0xff] }
   0x8   :  { %107 = vperm.xlu1 %2201, %v65_v5   ;;  %97 = vperm.xlu0 %2200, %v63_v6  }
   0x9   :  { %1972 = vmatmul.msk.f32.vlgmr.msra.gmra.mxu0 %vm255_vm0, %v29_v7  ;;  %1989 = vmatmul.msk.f32.vlgmr.msra.gmra.mxu2 %vm255_vm0, %v46_v8 }
   0xa   :  { %2004 = vmatmul.msk.f32.vlgmr.msra.gmra.mxu1 %vm255_vm0, %v29_v7  ;;  %2020 = vmatmul.msk.f32.vlgmr.msra.gmra.mxu3 %vm255_vm0, %v2298_v9 }
   0xb   :  { %14 = vsyncpa [#allocation4], 0  ;;  %v66_v11 = vld [vmem:[%s3514_s2 + $0x18] sm:$0xff]  ;;  %v64_v12 = vld [vmem:[%s3514_s2 + $0x8] sm:$0xff]  ;;  %s1963_s12 = sshll.u32 %s3519_s7, 4  ;;  %vm1948_vm1 = vcmask 1040384   ;;  %s1964_s12 = int_to_ptr.hbm [resolvable:$true] %s1963_s12 }
   0xc   :  { %v30_v13 = vld [vmem:[%s3513_s1 + $0x8] sm:$0xff]  ;;  %v47_v14 = vld [vmem:[%s3513_s1 + $0x90] sm:$0xff]  ;;  %v71_v15 = vld [vmem:[%s3514_s2 + $0x40] sm:$0xff] }
   0xd   :  { %v70_v16 = vld [vmem:[%s3514_s2 + $0x38] sm:$0xff]  ;;  %v69_v17 = vld [vmem:[%s3514_s2 + $0x30] sm:$0xff]  ;;  %v72_v22 = vld [vmem:[%s3514_s2 + $0x48] sm:$0xff] }
   0xe   :  { %v31_v18 = vld [vmem:[%s3513_s1 + $0x10] sm:$0xff]  ;;  %v48_v19 = vld [vmem:[%s3513_s1 + $0x98] sm:$0xff]  ;;  %v49_v24 = vld [vmem:[%s3513_s1 + $0xa0] sm:$0xff] }
   0xf   :  { %122 = vperm.xlu2 %2202, %v68_v10   ;;  %v74_v20 = vld [vmem:[%s3514_s2 + $0x58] sm:$0xff]  ;;  %v73_v21 = vld [vmem:[%s3514_s2 + $0x50] sm:$0xff]  ;;  %v76_v26 = vld [vmem:[%s3514_s2 + $0x68] sm:$0xff] }
  0x10   :  { %112 = vperm.xlu1 %2201, %v66_v11   ;;  %102 = vperm.xlu0 %2200, %v64_v12   ;;  %v32_v23 = vld [vmem:[%s3513_s1 + $0x18] sm:$0xff]  ;;  %v77_v25 = vld [vmem:[%s3514_s2 + $0x70] sm:$0xff]  ;;  %v75_v27 = vld [vmem:[%s3514_s2 + $0x60] sm:$0xff] }
  0x11   :  { %1973 = vmatmul.msk.f32.gmra.mxu0 %vm255_vm0, %v30_v13  ;;  %1990 = vmatmul.msk.f32.gmra.mxu2 %vm255_vm0, %v47_v14  ;;  %v33_v28 = vld [vmem:[%s3513_s1 + $0x20] sm:$0xff]  ;;  %v50_v29 = vld [vmem:[%s3513_s1 + $0xa8] sm:$0xff]  ;;  %v93_v30 = vld [vmem:[%s3514_s2 + $0xf0] sm:$0xff] }
  0x12   :  { %2005 = vmatmul.msk.f32.gmra.mxu1 %vm255_vm0, %v30_v13  ;;  %2021 = vmatmul.msk.f32.gmra.mxu3 %vm255_vm0, %v46_v8  ;;  %v79_v31 = vld [vmem:[%s3514_s2 + $0x80] sm:$0xff]  ;;  %v78_v32 = vld [vmem:[%s3514_s2 + $0x78] sm:$0xff]  ;;  %v34_v33 = vld [vmem:[%s3513_s1 + $0x28] sm:$0xff] }
  0x13   :  { %v51_v34 = vld [vmem:[%s3513_s1 + $0xb0] sm:$0xff]  ;;  %v92_v35 = vld [vmem:[%s3514_s2 + $0xe8] sm:$0xff]  ;;  %v91_v36 = vld [vmem:[%s3514_s2 + $0xe0] sm:$0xff] }
  0x14   :  { %v94_v37 = vld [vmem:[%s3514_s2 + $0xf8] sm:$0xff]  ;;  %v35_v38 = vld [vmem:[%s3513_s1 + $0x30] sm:$0xff]  ;;  %v87_v40 = vld [vmem:[%s3514_s2 + $0xc0] sm:$0xff] }
  0x15   :  { %v52_v39 = vld [vmem:[%s3513_s1 + $0xb8] sm:$0xff]  ;;  %v89_v42 = vld [vmem:[%s3514_s2 + $0xd0] sm:$0xff]  ;;  %v53_v44 = vld [vmem:[%s3513_s1 + $0xc0] sm:$0xff] }
  0x16   :  { %v90_v41 = vld [vmem:[%s3514_s2 + $0xd8] sm:$0xff]  ;;  %v85_v46 = vld [vmem:[%s3514_s2 + $0xb0] sm:$0xff]  ;;  %v88_v47 = vld [vmem:[%s3514_s2 + $0xc8] sm:$0xff] }
  0x17   :  { %137 = vperm.xlu2 %2202, %v71_v15   ;;  %v36_v43 = vld [vmem:[%s3513_s1 + $0x38] sm:$0xff]  ;;  %v37_v48 = vld [vmem:[%s3513_s1 + $0x40] sm:$0xff]  ;;  %v54_v49 = vld [vmem:[%s3513_s1 + $0xc8] sm:$0xff] }
  0x18   :  { %132 = vperm.xlu1 %2201, %v70_v16   ;;  %127 = vperm.xlu0 %2200, %v69_v17   ;;  %v86_v45 = vld [vmem:[%s3514_s2 + $0xb8] sm:$0xff]  ;;  %v81_v50 = vld [vmem:[%s3514_s2 + $0x90] sm:$0xff]  ;;  %v84_v51 = vld [vmem:[%s3514_s2 + $0xa8] sm:$0xff] }
  0x19   :  { %1974 = vmatmul.msk.f32.gmra.mxu0 %vm255_vm0, %v31_v18  ;;  %1991 = vmatmul.msk.f32.gmra.mxu2 %vm255_vm0, %v48_v19  ;;  %v83_v52 = vld [vmem:[%s3514_s2 + $0xa0] sm:$0xff]  ;;  %v38_v53 = vld [vmem:[%s3513_s1 + $0x48] sm:$0xff]  ;;  %v55_v54 = vld [vmem:[%s3513_s1 + $0xd0] sm:$0xff] }
  0x1a   :  { %2006 = vmatmul.msk.f32.gmra.mxu1 %vm255_vm0, %v31_v18  ;;  %2022 = vmatmul.msk.f32.gmra.mxu3 %vm255_vm0, %v47_v14  ;;  %v770_v55 = vld [vmem:[%s3516_s4] sm:$0xff]  ;;  %v80_v56 = vld [vmem:[%s3514_s2 + $0x88] sm:$0xff]  ;;  %v82_v57 = vld [vmem:[%s3514_s2 + $0x98] sm:$0xff] }
  0x1b   :  { %v39_v58 = vld [vmem:[%s3513_s1 + $0x50] sm:$0xff]  ;;  %v56_v59 = vld [vmem:[%s3513_s1 + $0xd8] sm:$0xff]  ;;  %v771_v62 = vld [vmem:[%s3516_s4 + $0x8] sm:$0xff] }
  0x1c   :  { %v773_v60 = vld [vmem:[%s3516_s4 + $0x18] sm:$0xff]  ;;  %v772_v61 = vld [vmem:[%s3516_s4 + $0x10] sm:$0xff]  ;;  %v57_v0 = vld [vmem:[%s3513_s1 + $0xe0] sm:$0xff] }
  0x1d   :  { %v40_v63 = vld [vmem:[%s3513_s1 + $0x58] sm:$0xff]  ;;  %v776_v1 = vld [vmem:[%s3516_s4 + $0x30] sm:$0xff]  ;;  %v775_v2 = vld [vmem:[%s3516_s4 + $0x28] sm:$0xff] }
  0x1e   :  { %v774_v3 = vld [vmem:[%s3516_s4 + $0x20] sm:$0xff]  ;;  %v58_v5 = vld [vmem:[%s3513_s1 + $0xe8] sm:$0xff]  ;;  %v777_v8 = vld [vmem:[%s3516_s4 + $0x38] sm:$0xff] }
  0x1f   :  { %152 = vperm.xlu2 %2202, %v74_v20   ;;  %v41_v4 = vld [vmem:[%s3513_s1 + $0x60] sm:$0xff]  ;;  %v779_v6 = vld [vmem:[%s3516_s4 + $0x48] sm:$0xff]  ;;  %v59_v11 = vld [vmem:[%s3513_s1 + $0xf0] sm:$0xff] }
  0x20   :  { %147 = vperm.xlu1 %2201, %v73_v21   ;;  %142 = vperm.xlu0 %2200, %v72_v22   ;;  %v778_v7 = vld [vmem:[%s3516_s4 + $0x40] sm:$0xff]  ;;  %v42_v10 = vld [vmem:[%s3513_s1 + $0x68] sm:$0xff]  ;;  %v781_v13 = vld [vmem:[%s3516_s4 + $0x58] sm:$0xff] }
  0x21   :  { %1975 = vmatmul.msk.f32.gmra.mxu0 %vm255_vm0, %v32_v23  ;;  %1992 = vmatmul.msk.f32.gmra.mxu2 %vm255_vm0, %v49_v24  ;;  %v782_v12 = vld [vmem:[%s3516_s4 + $0x60] sm:$0xff]  ;;  %v780_v14 = vld [vmem:[%s3516_s4 + $0x50] sm:$0xff]  ;;  %v60_v16 = vld [vmem:[%s3513_s1 + $0xf8] sm:$0xff] }
  0x22   :  { %2007 = vmatmul.msk.f32.gmra.mxu1 %vm255_vm0, %v32_v23  ;;  %2023 = vmatmul.msk.f32.gmra.mxu3 %vm255_vm0, %v48_v19  ;;  %v43_v15 = vld [vmem:[%s3513_s1 + $0x70] sm:$0xff]  ;;  %v785_v17 = vld [vmem:[%s3516_s4 + $0x78] sm:$0xff]  ;;  %v783_v19 = vld [vmem:[%s3516_s4 + $0x68] sm:$0xff] }
  0x23   :  { %v784_v18 = vld [vmem:[%s3516_s4 + $0x70] sm:$0xff]  ;;  %v44_v20 = vld [vmem:[%s3513_s1 + $0x78] sm:$0xff]  ;;  %v787_v23 = vld [vmem:[%s3516_s4 + $0x88] sm:$0xff] }
  0x24   :  { %v788_v22 = vld [vmem:[%s3516_s4 + $0x90] sm:$0xff] }
  0x27   :  { %167 = vperm.xlu2 %2202, %v77_v25  }
  0x28   :  { %162 = vperm.xlu1 %2201, %v76_v26   ;;  %157 = vperm.xlu0 %2200, %v75_v27  }
  0x29   :  { %1976 = vmatmul.msk.f32.gmra.mxu0 %vm255_vm0, %v33_v28  ;;  %1993 = vmatmul.msk.f32.gmra.mxu2 %vm255_vm0, %v50_v29 }
  0x2a   :  { %2008 = vmatmul.msk.f32.gmra.mxu1 %vm255_vm0, %v33_v28  ;;  %2024 = vmatmul.msk.f32.gmra.mxu3 %vm255_vm0, %v49_v24  ;;  %v786_v24 = vld [vmem:[%s3516_s4 + $0x80] sm:$0xff] }
  0x2f   :  { %247 = vperm.xlu2 %2202, %v93_v30   ;;  %v791_v30 = vld [vmem:[%s3516_s4 + $0xa8] sm:$0xff] }
  0x30   :  { %177 = vperm.xlu1 %2201, %v79_v31   ;;  %172 = vperm.xlu0 %2200, %v78_v32   ;;  %v790_v32 = vld [vmem:[%s3516_s4 + $0xa0] sm:$0xff] }
  0x31   :  { %1977 = vmatmul.msk.f32.gmra.mxu0 %vm255_vm0, %v34_v33  ;;  %1994 = vmatmul.msk.f32.gmra.mxu2 %vm255_vm0, %v51_v34 }
  0x32   :  { %2009 = vmatmul.msk.f32.gmra.mxu1 %vm255_vm0, %v34_v33  ;;  %2025 = vmatmul.msk.f32.gmra.mxu3 %vm255_vm0, %v50_v29  ;;  %v789_v33 = vld [vmem:[%s3516_s4 + $0x98] sm:$0xff] }
  0x37   :  { %242 = vperm.xlu2 %2202, %v92_v35  }
  0x38   :  { %237 = vperm.xlu1 %2201, %v91_v36   ;;  %252 = vperm.xlu0 %2200, %v94_v37  }
  0x39   :  { %1978 = vmatmul.msk.f32.gmra.mxu0 %vm255_vm0, %v35_v38  ;;  %1995 = vmatmul.msk.f32.gmra.mxu2 %vm255_vm0, %v52_v39 }
  0x3a   :  { %2010 = vmatmul.msk.f32.gmra.mxu1 %vm255_vm0, %v35_v38  ;;  %2026 = vmatmul.msk.f32.gmra.mxu3 %vm255_vm0, %v51_v34 }
  0x3f   :  { %217 = vperm.xlu2 %2202, %v87_v40  }
  0x40   :  { %232 = vperm.xlu1 %2201, %v90_v41   ;;  %227 = vperm.xlu0 %2200, %v89_v42  }
  0x41   :  { %1979 = vmatmul.msk.f32.gmra.mxu0 %vm255_vm0, %v36_v43  ;;  %1996 = vmatmul.msk.f32.gmra.mxu2 %vm255_vm0, %v53_v44 }
  0x42   :  { %2011 = vmatmul.msk.f32.gmra.mxu1 %vm255_vm0, %v36_v43  ;;  %2027 = vmatmul.msk.f32.gmra.mxu3 %vm255_vm0, %v52_v39 }
  0x47   :  { %212 = vperm.xlu2 %2202, %v86_v45  }
  0x48   :  { %207 = vperm.xlu1 %2201, %v85_v46   ;;  %222 = vperm.xlu0 %2200, %v88_v47   ;;  %v794_v47 = vld [vmem:[%s3516_s4 + $0xc0] sm:$0xff] }
  0x49   :  { %1980 = vmatmul.msk.f32.gmra.mxu0 %vm255_vm0, %v37_v48  ;;  %1997 = vmatmul.msk.f32.gmra.mxu2 %vm255_vm0, %v54_v49 }
  0x4a   :  { %2012 = vmatmul.msk.f32.gmra.mxu1 %vm255_vm0, %v37_v48  ;;  %2028 = vmatmul.msk.f32.gmra.mxu3 %vm255_vm0, %v53_v44 }
  0x4f   :  { %187 = vperm.xlu2 %2202, %v81_v50  }
  0x50   :  { %202 = vperm.xlu1 %2201, %v84_v51   ;;  %197 = vperm.xlu0 %2200, %v83_v52   ;;  %v793_v51 = vld [vmem:[%s3516_s4 + $0xb8] sm:$0xff]  ;;  %v792_v52 = vld [vmem:[%s3516_s4 + $0xb0] sm:$0xff] }
  0x51   :  { %1981 = vmatmul.msk.f32.gmra.mxu0 %vm255_vm0, %v38_v53  ;;  %1998 = vmatmul.msk.f32.gmra.mxu2 %vm255_vm0, %v55_v54 }
  0x52   :  { %2013 = vmatmul.msk.f32.gmra.mxu1 %vm255_vm0, %v38_v53  ;;  %2029 = vmatmul.msk.f32.gmra.mxu3 %vm255_vm0, %v54_v49 }
  0x57   :  { %804 = vperm.xlu2 %2202, %v770_v55  }
  0x58   :  { %182 = vperm.xlu1 %2201, %v80_v56   ;;  %192 = vperm.xlu0 %2200, %v82_v57  }
  0x59   :  { %1982 = vmatmul.msk.f32.gmra.mxu0 %vm255_vm0, %v39_v58  ;;  %1999 = vmatmul.msk.f32.gmra.mxu2 %vm255_vm0, %v56_v59 }
  0x5a   :  { %2014 = vmatmul.msk.f32.gmra.mxu1 %vm255_vm0, %v39_v58  ;;  %2030 = vmatmul.msk.f32.gmra.mxu3 %vm255_vm0, %v55_v54 }
  0x5f   :  { %819 = vperm.xlu2 %2202, %v773_v60   ;;  %v797_v60 = vld [vmem:[%s3516_s4 + $0xd8] sm:$0xff] }
  0x60   :  { %814 = vperm.xlu1 %2201, %v772_v61   ;;  %809 = vperm.xlu0 %2200, %v771_v62   ;;  %v796_v62 = vld [vmem:[%s3516_s4 + $0xd0] sm:$0xff] }
  0x61   :  { %1983 = vmatmul.msk.f32.gmra.mxu0 %vm255_vm0, %v40_v63  ;;  %2000 = vmatmul.msk.f32.gmra.mxu2 %vm255_vm0, %v57_v0  ;;  %v118_v49 = vpop.permute.xlu2 %117 }
  0x62   :  { %2015 = vmatmul.msk.f32.gmra.mxu1 %vm255_vm0, %v40_v63  ;;  %2031 = vmatmul.msk.f32.gmra.mxu3 %vm255_vm0, %v56_v59  ;;  %v795_v63 = vld [vmem:[%s3516_s4 + $0xc8] sm:$0xff] }
  0x67   :  { %834 = vperm.xlu2 %2202, %v776_v1  }
  0x68   :  { %829 = vperm.xlu1 %2201, %v775_v2   ;;  %824 = vperm.xlu0 %2200, %v774_v3  }
  0x69   :  { %1984 = vmatmul.msk.f32.gmra.mxu0 %vm255_vm0, %v41_v4  ;;  %2001 = vmatmul.msk.f32.gmra.mxu2 %vm255_vm0, %v58_v5  ;;  %v2640_v2 = vpop.permute.xlu2 %122 }
  0x6a   :  { %2016 = vmatmul.msk.f32.gmra.mxu1 %vm255_vm0, %v41_v4  ;;  %2032 = vmatmul.msk.f32.gmra.mxu3 %vm255_vm0, %v57_v0 }
  0x6f   :  { %849 = vperm.xlu2 %2202, %v779_v6  }
  0x70   :  { %844 = vperm.xlu1 %2201, %v778_v7   ;;  %839 = vperm.xlu0 %2200, %v777_v8  }
  0x71   :  { %1985 = vmatmul.msk.f32.gmra.mxu0 %vm255_vm0, %v42_v10  ;;  %2002 = vmatmul.msk.f32.gmra.mxu2 %vm255_vm0, %v59_v11 }
  0x72   :  { %2017 = vmatmul.msk.f32.gmra.mxu1 %vm255_vm0, %v42_v10  ;;  %2033 = vmatmul.msk.f32.gmra.mxu3 %vm255_vm0, %v58_v5 }
  0x77   :  { %864 = vperm.xlu2 %2202, %v782_v12  }
  0x78   :  { %859 = vperm.xlu1 %2201, %v781_v13   ;;  %854 = vperm.xlu0 %2200, %v780_v14  }
  0x79   :  { %1986 = vmatmul.msk.f32.gmra.mxu0 %vm255_vm0, %v43_v15  ;;  %2003 = vmatmul.msk.f32.gmra.mxu2 %vm255_vm0, %v60_v16 }
  0x7a   :  { %2018 = vmatmul.msk.f32.gmra.mxu1 %vm255_vm0, %v43_v15  ;;  %2034 = vmatmul.msk.f32.gmra.mxu3 %vm255_vm0, %v59_v11  ;;  %v98_v21 = vpop.permute.xlu0 %97  ;;  %v108_v44 = vpop.permute.xlu1 %107  ;;  %v800_v15 = vld [vmem:[%s3516_s4 + $0xf0] sm:$0xff] }
  0x7f   :  { %879 = vperm.xlu2 %2202, %v785_v17  }
  0x80   :  { %874 = vperm.xlu1 %2201, %v784_v18   ;;  %869 = vperm.xlu0 %2200, %v783_v19   ;;  %v799_v18 = vld [vmem:[%s3516_s4 + $0xe8] sm:$0xff]  ;;  %v798_v19 = vld [vmem:[%s3516_s4 + $0xe0] sm:$0xff] }
  0x81   :  { %1987 = vmatmul.msk.f32.gmra.mxu0 %vm255_vm0, %v44_v20 }
  0x82   :  { %2019 = vmatmul.msk.f32.gmra.mxu1 %vm255_vm0, %v44_v20  ;;  %2035 = vmatmul.msk.f32.gmra.mxu3 %vm255_vm0, %v60_v16  ;;  %v103_v34 = vpop.permute.xlu0 %102  ;;  %v113_v0 = vpop.permute.xlu1 %112 }
  0x86   :  { %v369_v25 = vpop.f32.mrf.mxu0 }
  0x87   :  { %v482_v26 = vpop.f32.mrf.mxu1  ;;  %894 = vperm.xlu2 %2202, %v788_v22   ;;  %v370_v28 = vadd.f32 %v369_v25, %v98_v21  ;;  %v2661_v25 = vpop.permute.xlu2 %137 }
  0x88   :  { %v483_v27 = vadd.f32 %v482_v26, %v98_v21  ;;  %889 = vperm.xlu1 %2201, %v787_v23   ;;  %884 = vperm.xlu0 %2200, %v786_v24  }
  0x89   :  { %1988 = vmatmul.msk.f32.gmra.mxu0 %vm255_vm0, %v2298_v9  ;;  %v578_v9 = vmul.f32 0.01, %v370_v28 }
  0x8a   :  { %v579_v38 = vmul.f32 0.01, %v483_v27  ;;  %v2663_v26 = vpop.permute.xlu1 %132 }
  0x8b   :  { %v642_v43 = vmax.f32 %v370_v28, %v578_v9 }
  0x8c   :  { %v2597_v29 = vpop.f32.mrf.mxu2  ;;  %v643_v45 = vmax.f32 %v483_v27, %v579_v38  ;;  %v2665_v27 = vpop.permute.xlu0 %127 }
  0x8d   :  { %3546 = vst [vmem:[#allocation6_spill] sm:$0xff] %v2597_v29  ;;  %v2602_v31 = vpop.f32.mrf.mxu3 }
  0x8e   :  { %3547 = vst [vmem:[#allocation7_spill] sm:$0xff] %v2602_v31  ;;  %v372_v35 = vpop.f32.mrf.mxu0 }
  0x8f   :  { %v373_v36 = vadd.f32 %v372_v35, %v103_v34  ;;  %v485_v37 = vpop.f32.mrf.mxu1  ;;  %909 = vperm.xlu2 %2202, %v791_v30   ;;  %v801_v35 = vld [vmem:[%s3516_s4 + $0xf8] sm:$0xff] }
  0x90   :  { %v486_v39 = vadd.f32 %v485_v37, %v103_v34  ;;  %904 = vperm.xlu1 %2201, %v790_v32   ;;  %899 = vperm.xlu0 %2200, %v789_v33   ;;  %v1607_v32 = vld [vmem:[%s3517_s5 + $0x8] sm:$0xff]  ;;  %v1606_v34 = vld [vmem:[%s3517_s5] sm:$0xff] }
  0x91   :  { %v580_v40 = vmul.f32 0.01, %v373_v36 }
  0x92   :  { %v581_v41 = vmul.f32 0.01, %v486_v39 }
  0x93   :  { %v644_v42 = vmax.f32 %v373_v36, %v580_v40  ;;  %v2683_v40 = vpop.permute.xlu2 %152 }
  0x94   :  { %v2610_v46 = vpop.f32.mrf.mxu2  ;;  %v645_v48 = vmax.f32 %v486_v39, %v581_v41 }
  0x95   :  { %v2615_v50 = vpop.f32.mrf.mxu3  ;;  %v2623_v53 = vpack.c.bf16 %v644_v42, %v642_v43  ;;  %v2685_v43 = vpop.permute.xlu1 %147 }
  0x96   :  { %3548 = vst [vmem:[#allocation8_spill] sm:$0xff] %v2615_v50  ;;  %v375_v54 = vpop.f32.mrf.mxu0  ;;  %v2625_v55 = vpack.c.bf16 %v645_v48, %v643_v45  ;;  %v1610_v45 = vld [vmem:[%s3517_s5 + $0x20] sm:$0xff] }
  0x97   :  { %3549 = vst [vmem:[#allocation9_spill] sm:$0xff] %v2623_v53  ;;  %v488_v56 = vpop.f32.mrf.mxu1  ;;  %924 = vperm.xlu2 %2202, %v794_v47   ;;  %v376_v58 = vadd.f32 %v375_v54, %v108_v44  ;;  %v2692_v47 = vpop.permute.xlu0 %142 }
  0x98   :  { %3550 = vst [vmem:[#allocation10_spill] sm:$0xff] %v2625_v55  ;;  %v489_v57 = vadd.f32 %v488_v56, %v108_v44  ;;  %919 = vperm.xlu1 %2201, %v793_v51   ;;  %914 = vperm.xlu0 %2200, %v792_v52   ;;  %v1608_v51 = vld [vmem:[%s3517_s5 + $0x10] sm:$0xff] }
  0x99   :  { %v582_v3 = vmul.f32 0.01, %v376_v58  ;;  %v1628_v55 = vld [vmem:[%s3517_s5 + $0xb0] sm:$0xff] }
  0x9a   :  { %v583_v6 = vmul.f32 0.01, %v489_v57 }
  0x9b   :  { %v646_v12 = vmax.f32 %v376_v58, %v582_v3  ;;  %v1613_v58 = vld [vmem:[%s3517_s5 + $0x38] sm:$0xff] }
  0x9c   :  { %v2627_v59 = vpop.f32.mrf.mxu2  ;;  %v647_v13 = vmax.f32 %v489_v57, %v583_v6 }
  0x9d   :  { %3551 = vst [vmem:[#allocation11_spill] sm:$0xff] %v2627_v59  ;;  %v2632_v61 = vpop.f32.mrf.mxu3 }
  0x9e   :  { %3552 = vst [vmem:[#allocation12_spill] sm:$0xff] %v2632_v61  ;;  %v378_v1 = vpop.f32.mrf.mxu0 }
  0x9f   :  { %v379_v4 = vadd.f32 %v378_v1, %v113_v0  ;;  %v491_v5 = vpop.f32.mrf.mxu1  ;;  %939 = vperm.xlu2 %2202, %v797_v60   ;;  %v2713_v60 = vpop.permute.xlu2 %167 }
  0xa0   :  { %v492_v7 = vadd.f32 %v491_v5, %v113_v0  ;;  %934 = vperm.xlu1 %2201, %v796_v62   ;;  %929 = vperm.xlu0 %2200, %v795_v63   ;;  %v1612_v63 = vld [vmem:[%s3517_s5 + $0x30] sm:$0xff]  ;;  %v1611_v0 = vld [vmem:[%s3517_s5 + $0x28] sm:$0xff]  ;;  %v2723_v1 = vpop.permute.xlu1 %162 }
  0xa1   :  { %v584_v8 = vmul.f32 0.01, %v379_v4 }
  0xa2   :  { %v585_v10 = vmul.f32 0.01, %v492_v7 }
  0xa3   :  { %v648_v11 = vmax.f32 %v379_v4, %v584_v8  ;;  %v2727_v4 = vpop.permute.xlu0 %157 }
  0xa4   :  { %v2642_v14 = vpop.f32.mrf.mxu2  ;;  %v649_v16 = vmax.f32 %v492_v7, %v585_v10  ;;  %v1616_v7 = vld [vmem:[%s3517_s5 + $0x50] sm:$0xff]  ;;  %v1615_v10 = vld [vmem:[%s3517_s5 + $0x48] sm:$0xff] }
  0xa5   :  { %v2647_v17 = vpop.f32.mrf.mxu3  ;;  %v2655_v20 = vpack.c.bf16 %v648_v11, %v646_v12  ;;  %v1614_v11 = vld [vmem:[%s3517_s5 + $0x40] sm:$0xff] }
  0xa6   :  { %3553 = vst [vmem:[#allocation13_spill] sm:$0xff] %v2647_v17  ;;  %v381_v21 = vpop.f32.mrf.mxu0  ;;  %v2657_v22 = vpack.c.bf16 %v649_v16, %v647_v13  ;;  %v1631_v17 = vld [vmem:[%s3517_s5 + $0xc8] sm:$0xff] }
  0xa7   :  { %3554 = vst [vmem:[#allocation14_spill] sm:$0xff] %v2655_v20  ;;  %v494_v23 = vpop.f32.mrf.mxu1  ;;  %954 = vperm.xlu2 %2202, %v800_v15   ;;  %v382_v28 = vadd.f32 %v381_v21, %v118_v49  ;;  %v2746_v13 = vpop.permute.xlu2 %247  ;;  %v1619_v21 = vld [vmem:[%s3517_s5 + $0x68] sm:$0xff] }
  0xa8   :  { %3555 = vst [vmem:[#allocation15_spill] sm:$0xff] %v2657_v22  ;;  %v2659_v24 = vadd.f32 %v494_v23, %v118_v49  ;;  %949 = vperm.xlu1 %2201, %v799_v18   ;;  %944 = vperm.xlu0 %2200, %v798_v19   ;;  %v1609_v49 = vld [vmem:[%s3517_s5 + $0x18] sm:$0xff]  ;;  %v2750_v16 = vpop.permute.xlu1 %177  ;;  %v1627_v20 = vld [vmem:[%s3517_s5 + $0xa8] sm:$0xff] }
  0xa9   :  { %v586_v36 = vmul.f32 0.01, %v382_v28  ;;  %3561 = vst [vmem:[#allocation21_spill] sm:$0xff] %v2750_v16 }
  0xaa   :  { %3556 = vst [vmem:[#allocation16_spill] sm:$0xff] %v2659_v24 }
  0xab   :  { %v650_v42 = vmax.f32 %v382_v28, %v586_v36  ;;  %v2752_v18 = vpop.permute.xlu0 %172  ;;  %v1618_v28 = vld [vmem:[%s3517_s5 + $0x60] sm:$0xff] }
  0xac   :  { %v2667_v30 = vpop.f32.mrf.mxu2 }
  0xad   :  { %v2672_v33 = vpop.f32.mrf.mxu3 }
  0xae   :  { %3557 = vst [vmem:[#allocation17_spill] sm:$0xff] %v2672_v33  ;;  %v384_v9 = vpop.f32.mrf.mxu0 }
  0xaf   :  { %v385_v37 = vadd.f32 %v384_v9, %v2640_v2  ;;  %v2681_v38 = vpop.f32.mrf.mxu1  ;;  %1645 = vperm.xlu2 %2202, %v1607_v32   ;;  %v1617_v32 = vld [vmem:[%s3517_s5 + $0x58] sm:$0xff]  ;;  %v2771_v9 = vpop.permute.xlu2 %242 }
  0xb0   :  { %1640 = vperm.xlu1 %2201, %v1606_v34   ;;  %959 = vperm.xlu0 %2200, %v801_v35   ;;  %v2773_v36 = vpop.permute.xlu1 %237 }
  0xb1   :  { %v588_v39 = vmul.f32 0.01, %v385_v37 }
  0xb3   :  { %v652_v41 = vmax.f32 %v385_v37, %v588_v39  ;;  %v2775_v37 = vpop.permute.xlu0 %252 }
  0xb4   :  { %v2687_v44 = vpop.f32.mrf.mxu2 }
  0xb5   :  { %v2694_v48 = vpop.f32.mrf.mxu3  ;;  %v2702_v52 = vpack.c.bf16 %v652_v41, %v650_v42  ;;  %v1622_v41 = vld [vmem:[%s3517_s5 + $0x80] sm:$0xff] }
  0xb6   :  { %3558 = vst [vmem:[#allocation18_spill] sm:$0xff] %v2694_v48  ;;  %v2704_v54 = vpop.f32.mrf.mxu0 }
  0xb7   :  { %3559 = vst [vmem:[#allocation19_spill] sm:$0xff] %v2702_v52  ;;  %v2706_v56 = vpop.f32.mrf.mxu1  ;;  %1660 = vperm.xlu2 %2202, %v1610_v45   ;;  %v1621_v45 = vld [vmem:[%s3517_s5 + $0x78] sm:$0xff]  ;;  %v2840_v52 = vadd.f32 %v2704_v54, %v2665_v27 }
  0xb8   :  { %1655 = vperm.xlu1 %2201, %v1609_v49   ;;  %1650 = vperm.xlu0 %2200, %v1608_v51   ;;  %v1620_v49 = vld [vmem:[%s3517_s5 + $0x70] sm:$0xff]  ;;  %v2849_v29 = vadd.f32 %v2706_v56, %v2665_v27  ;;  %v2868_v27 = vadd.f32 %v2681_v38, %v2640_v2  ;;  %v2887_v2 = vmul.f32 0.01, %v2659_v24 }
  0xb9   :  { %3565 = vst [vmem:[#allocation25_spill] sm:$0xff] %v2840_v52  ;;  %v2877_v59 = vmul.f32 0.01, %v2840_v52 }
  0xba   :  { %3566 = vst [vmem:[#allocation26_spill] sm:$0xff] %v2849_v29 }
  0xbb   :  { %3569 = vst [vmem:[#allocation29_spill] sm:$0xff] %v2868_v27 }
  0xbc   :  { %v2708_v57 = vpop.f32.mrf.mxu2  ;;  %3571 = vst [vmem:[#allocation31_spill] sm:$0xff] %v2877_v59 }
  0xbd   :  { %v2715_v62 = vpop.f32.mrf.mxu3  ;;  %3575 = vst [vmem:[#allocation35_spill] sm:$0xff] %v2887_v2 }
  0xbe   :  { %v2725_v3 = vpop.f32.mrf.mxu0 }
  0xbf   :  { %v2729_v5 = vpop.f32.mrf.mxu1  ;;  %1675 = vperm.xlu2 %2202, %v1613_v58  }
  0xc0   :  { %1670 = vperm.xlu1 %2201, %v1612_v63   ;;  %1665 = vperm.xlu0 %2200, %v1611_v0   ;;  %v2794_v63 = vpop.permute.xlu2 %217  ;;  %v2796_v0 = vpop.permute.xlu1 %232  ;;  %v2908_v24 = vadd.f32 %v2729_v5, %v2663_v26 }
  0xc1   :  { %3563 = vst [vmem:[#allocation23_spill] sm:$0xff] %v2794_v63 }
  0xc2   :  { %3581 = vst [vmem:[#allocation41_spill] sm:$0xff] %v2908_v24 }
  0xc4   :  { %v2731_v6 = vpop.f32.mrf.mxu2 }
  0xc5   :  { %v2736_v8 = vpop.f32.mrf.mxu3 }
  0xc6   :  { %3560 = vst [vmem:[#allocation20_spill] sm:$0xff] %v2736_v8  ;;  %v2744_v12 = vpop.f32.mrf.mxu0  ;;  %v2882_v8 = vmul.f32 0.01, %v2849_v29 }
  0xc7   :  { %v2748_v15 = vpop.f32.mrf.mxu1  ;;  %1690 = vperm.xlu2 %2202, %v1616_v7  }
  0xc8   :  { %1685 = vperm.xlu1 %2201, %v1615_v10   ;;  %1680 = vperm.xlu0 %2200, %v1614_v11   ;;  %v1625_v10 = vld [vmem:[%s3517_s5 + $0x98] sm:$0xff]  ;;  %v2803_v11 = vpop.permute.xlu0 %227  ;;  %v2822_v53 = vpop.permute.xlu2 %212  ;;  %3573 = vst [vmem:[#allocation33_spill] sm:$0xff] %v2882_v8  ;;  %v2966_v8 = vmul.f32 0.01, %v2908_v24 }
  0xc9   :  { %3564 = vst [vmem:[#allocation24_spill] sm:$0xff] %v2822_v53  ;;  %v2872_v56 = vadd.f32 %v2708_v57, %v2822_v53  ;;  %v2898_v57 = vadd.f32 %v2725_v3, %v2663_v26  ;;  %v2920_v3 = vadd.f32 %v2731_v6, %v2794_v63  ;;  %v1634_v26 = vld [vmem:[%s3517_s5 + $0xe0] sm:$0xff]  ;;  %v2938_v6 = vadd.f32 %v2744_v12, %v2661_v25 }
  0xca   :  { %3589 = vst [vmem:[#allocation49_spill] sm:$0xff] %v2966_v8 }
  0xcb   :  { %3570 = vst [vmem:[#allocation30_spill] sm:$0xff] %v2872_v56 }
  0xcc   :  { %v2754_v19 = vpop.f32.mrf.mxu2  ;;  %3578 = vst [vmem:[#allocation38_spill] sm:$0xff] %v2898_v57 }
  0xcd   :  { %v2759_v23 = vpop.f32.mrf.mxu3  ;;  %3585 = vst [vmem:[#allocation45_spill] sm:$0xff] %v2938_v6 }
  0xce   :  { %3562 = vst [vmem:[#allocation22_spill] sm:$0xff] %v2759_v23  ;;  %v2767_v34 = vpop.f32.mrf.mxu0 }
  0xcf   :  { %v2769_v35 = vpop.f32.mrf.mxu1  ;;  %1705 = vperm.xlu2 %2202, %v1619_v21  }
  0xd0   :  { %1700 = vperm.xlu1 %2201, %v1618_v28   ;;  %1695 = vperm.xlu0 %2200, %v1617_v32   ;;  %v1624_v28 = vld [vmem:[%s3517_s5 + $0x90] sm:$0xff]  ;;  %v1623_v32 = vld [vmem:[%s3517_s5 + $0x88] sm:$0xff]  ;;  %v2834_v31 = vpop.permute.xlu0 %222  ;;  %v2864_v16 = vpop.permute.xlu2 %187 }
  0xd1   :  { %3568 = vst [vmem:[#allocation28_spill] sm:$0xff] %v2864_v16  ;;  %v2891_v38 = vadd.f32 %v2610_v46, %v2864_v16  ;;  %v2957_v12 = vadd.f32 %v2754_v19, %v2834_v31 }
  0xd3   :  { %3576 = vst [vmem:[#allocation36_spill] sm:$0xff] %v2891_v38 }
  0xd4   :  { %v2777_v39 = vpop.f32.mrf.mxu2 }
  0xd5   :  { %v2782_v42 = vpop.f32.mrf.mxu3 }
  0xd6   :  { %v2790_v51 = vpop.f32.mrf.mxu0 }
  0xd7   :  { %v2792_v58 = vpop.f32.mrf.mxu1  ;;  %1720 = vperm.xlu2 %2202, %v1622_v41   ;;  %v2988_v2 = vadd.f32 %v2790_v51, %v2685_v43 }
  0xd8   :  { %1715 = vperm.xlu1 %2201, %v1621_v45   ;;  %1710 = vperm.xlu0 %2200, %v1620_v49   ;;  %v2884_v23 = vpop.permute.xlu0 %197 }
  0xd9   :  { %3574 = vst [vmem:[#allocation34_spill] sm:$0xff] %v2884_v23  ;;  %v2916_v16 = vadd.f32 %v2642_v14, %v2884_v23  ;;  %v1632_v14 = vld [vmem:[%s3517_s5 + $0xd0] sm:$0xff] }
  0xdb   :  { %3583 = vst [vmem:[#allocation43_spill] sm:$0xff] %v2916_v16  ;;  %v2978_v59 = vmul.f32 0.01, %v2916_v16  ;;  %v3028_v16 = vmul.f32 0.01, %v2988_v2 }
  0xdc   :  { %v2798_v7 = vpop.f32.mrf.mxu2 }
  0xdd   :  { %v2805_v21 = vpop.f32.mrf.mxu3  ;;  %3592 = vst [vmem:[#allocation52_spill] sm:$0xff] %v2978_v59 }
  0xde   :  { %v2813_v41 = vpop.f32.mrf.mxu0 }
  0xdf   :  { %v2815_v45 = vpop.f32.mrf.mxu1  ;;  %1735 = vperm.xlu2 %2202, %v1625_v10   ;;  %v1626_v10 = vld [vmem:[%s3517_s5 + $0xa0] sm:$0xff] }
  0xe0   :  { %1730 = vperm.xlu1 %2201, %v1624_v28   ;;  %1725 = vperm.xlu0 %2200, %v1623_v32   ;;  %v208_v28 = vpop.permute.xlu1 %207 }
  0xe1   :  { %v2860_v54 = vadd.f32 %v2687_v44, %v208_v28  ;;  %v2934_v5 = vadd.f32 %v2715_v62, %v208_v28  ;;  %v2953_v62 = vmul.f32 0.01, %v2898_v57  ;;  %v2981_v28 = vmul.f32 0.01, %v2920_v3 }
  0xe3   :  { %3567 = vst [vmem:[#allocation27_spill] sm:$0xff] %v2860_v54 }
  0xe4   :  { %v2817_v49 = vpop.f32.mrf.mxu2  ;;  %3584 = vst [vmem:[#allocation44_spill] sm:$0xff] %v2934_v5  ;;  %v2973_v5 = vadd.f32 %v2769_v35, %v2692_v47 }
  0xe5   :  { %v2824_v22 = vpop.f32.mrf.mxu3  ;;  %3587 = vst [vmem:[#allocation47_spill] sm:$0xff] %v2953_v62 }
  0xe6   :  { %v2832_v32 = vpop.f32.mrf.mxu0  ;;  %3591 = vst [vmem:[#allocation51_spill] sm:$0xff] %v2973_v5 }
  0xe7   :  { %v2836_v50 = vpop.f32.mrf.mxu1  ;;  %1750 = vperm.xlu2 %2202, %v1628_v55   ;;  %v1630_v55 = vld [vmem:[%s3517_s5 + $0xc0] sm:$0xff] }
  0xe8   :  { %1745 = vperm.xlu1 %2201, %v1627_v20   ;;  %1740 = vperm.xlu0 %2200, %v1626_v10   ;;  %v1629_v20 = vld [vmem:[%s3517_s5 + $0xb8] sm:$0xff]  ;;  %v2879_v44 = vpop.permute.xlu1 %202 }
  0xe9   :  { %3572 = vst [vmem:[#allocation32_spill] sm:$0xff] %v2879_v44  ;;  %v2912_v46 = vadd.f32 %v2667_v30, %v2879_v44  ;;  %v1633_v30 = vld [vmem:[%s3517_s5 + $0xd8] sm:$0xff]  ;;  %v3002_v44 = vmul.f32 0.01, %v2957_v12 }
  0xeb   :  { %3582 = vst [vmem:[#allocation42_spill] sm:$0xff] %v2912_v46  ;;  %v2969_v29 = vmul.f32 0.01, %v2912_v46  ;;  %v3016_v46 = vmul.f32 0.01, %v2973_v5 }
  0xec   :  { %v2842_v61 = vpop.f32.mrf.mxu2 }
  0xed   :  { %v2851_v48 = vpop.f32.mrf.mxu3  ;;  %3590 = vst [vmem:[#allocation50_spill] sm:$0xff] %v2969_v29 }
  0xee   :  { %v2862_v10 = vpop.f32.mrf.mxu0  ;;  %3596 = vst [vmem:[#allocation56_spill] sm:$0xff] %v3016_v46 }
  0xef   :  { %v2874_v33 = vpop.f32.mrf.mxu1  ;;  %1765 = vperm.xlu2 %2202, %v1631_v17   ;;  %v2894_v17 = vmul.f32 0.01, %v2860_v54 }
  0xf0   :  { %1760 = vperm.xlu1 %2201, %v1630_v55   ;;  %1755 = vperm.xlu0 %2200, %v1629_v20   ;;  %v2901_v55 = vmul.f32 0.01, %v2868_v27  ;;  %v2904_v20 = vmul.f32 0.01, %v2872_v56  ;;  %v2924_v27 = vadd.f32 %v2777_v39, %v2803_v11  ;;  %v2942_v39 = vadd.f32 %v2748_v15, %v2661_v25 }
  0xf1   :  { %3577 = vst [vmem:[#allocation37_spill] sm:$0xff] %v2894_v17  ;;  %v2961_v25 = vadd.f32 %v2767_v34, %v2692_v47  ;;  %v2991_v47 = vmul.f32 0.01, %v2938_v6 }
  0xf2   :  { %3579 = vst [vmem:[#allocation39_spill] sm:$0xff] %v2901_v55  ;;  %v2984_v52 = vmul.f32 0.01, %v2924_v27  ;;  %v2994_v35 = vmul.f32 0.01, %v2942_v39 }
  0xf3   :  { %3580 = vst [vmem:[#allocation40_spill] sm:$0xff] %v2904_v20  ;;  %v3005_v51 = vmul.f32 0.01, %v2961_v25 }
  0xf4   :  { %v459_v55 = vpop.f32.mrf.mxu2  ;;  %3586 = vst [vmem:[#allocation46_spill] sm:$0xff] %v2942_v39  ;;  %v519_v39 = vadd.f32 %v2836_v50, %v2727_v4 }
  0xf5   :  { %v2944_v38 = vpop.f32.mrf.mxu3  ;;  %3588 = vst [vmem:[#allocation48_spill] sm:$0xff] %v2961_v25  ;;  %v460_v34 = vadd.f32 %v459_v55, %v2746_v13  ;;  %v457_v55 = vadd.f32 %v2842_v61, %v2771_v9 }
  0xf6   :  { %v411_v15 = vpop.f32.mrf.mxu0  ;;  %3593 = vst [vmem:[#allocation53_spill] sm:$0xff] %v2991_v47  ;;  %v603_v50 = vmul.f32 0.01, %v519_v39 }
  0xf7   :  { %v524_v19 = vpop.f32.mrf.mxu1  ;;  %1780 = vperm.xlu2 %2202, %v1634_v26   ;;  %3594 = vst [vmem:[#allocation54_spill] sm:$0xff] %v2994_v35  ;;  %v2998_v26 = vadd.f32 %v2798_v7, %v2796_v0  ;;  %v3020_v7 = vadd.f32 %v2792_v58, %v2685_v43  ;;  %v412_v29 = vadd.f32 %v411_v15, %v2713_v60  ;;  %v1637_v43 = vld [vmem:[%s3517_s5 + $0xf8] sm:$0xff]  ;;  %v638_v15 = vmul.f32 0.01, %v460_v34 }
  0xf8   :  { %1775 = vperm.xlu1 %2201, %v1633_v30   ;;  %1770 = vperm.xlu0 %2200, %v1632_v14   ;;  %3595 = vst [vmem:[#allocation55_spill] sm:$0xff] %v3005_v51  ;;  %v3009_v30 = vadd.f32 %v2813_v41, %v2683_v40  ;;  %v3013_v14 = vadd.f32 %v2815_v45, %v2683_v40  ;;  %v636_v56 = vmul.f32 0.01, %v457_v55 }
  0xf9   :  { %v454_v40 = vadd.f32 %v2817_v49, %v2773_v36  ;;  %v525_v45 = vadd.f32 %v524_v19, %v2713_v60  ;;  %v3037_v61 = vmul.f32 0.01, %v2998_v26  ;;  %v3041_v58 = vadd.f32 %v2862_v10, %v2723_v1  ;;  %v1636_v60 = vld [vmem:[%s3517_s5 + $0xf0] sm:$0xff]  ;;  %v1635_v49 = vld [vmem:[%s3517_s5 + $0xe8] sm:$0xff] }
  0xfa   :  { %v3051_v19 = vmul.f32 0.01, %v3009_v30  ;;  %v3054_v8 = vmul.f32 0.01, %v3013_v14  ;;  %v406_v10 = vadd.f32 %v2832_v32, %v2727_v4  ;;  %v606_v17 = vmul.f32 0.01, %v412_v29 }
  0xfb   :  { %v634_v62 = vmul.f32 0.01, %v454_v40  ;;  %v607_v35 = vmul.f32 0.01, %v525_v45  ;;  %v604_v32 = vmul.f32 0.01, %v3041_v58  ;;  %v700_v63 = vmax.f32 %v457_v55, %v636_v56 }
  0xfc   :  { %v462_v59 = vpop.f32.mrf.mxu2  ;;  %v602_v53 = vmul.f32 0.01, %v406_v10  ;;  %v670_v51 = vmax.f32 %v412_v29, %v606_v17  ;;  %v3068_v4 = vadd.f32 %v2944_v38, %v2771_v9  ;;  %v599_v9 = vmul.f32 0.01, %v3020_v7  ;;  %v3599_v55 = vld [vmem:[#allocation22_spill] sm:$0xff] }
  0xfd   :  { %v463_v41 = vadd.f32 %v462_v59, %v2775_v37  ;;  %v572_v24 = vpop.f32.mrf.mxu3  ;;  %v522_v59 = vadd.f32 %v2874_v33, %v2723_v1  ;;  %v702_v33 = vmax.f32 %v460_v34, %v638_v15  ;;  %v668_v34 = vmax.f32 %v3041_v58, %v604_v32  ;;  %v3602_v58 = vld [vmem:[#allocation56_spill] sm:$0xff]  ;;  %v3603_v15 = vld [vmem:[#allocation51_spill] sm:$0xff] }
  0xfe   :  { %v414_v20 = vpop.f32.mrf.mxu0 }
  0xff   :  { %v640_v54 = vmul.f32 0.01, %v463_v41  ;;  %v415_v23 = vadd.f32 %v414_v20, %v2752_v18  ;;  %v527_v57 = vpop.f32.mrf.mxu1  ;;  %1795 = vperm.xlu2 %2202, %v1637_v43   ;;  %v605_v5 = vmul.f32 0.01, %v522_v59  ;;  %v573_v20 = vadd.f32 %v572_v24, %v2746_v13  ;;  %v1936_v13 = vld [vmem:[#allocation2] sm:$0x1] }
 0x100   :  { %v528_v6 = vadd.f32 %v527_v57, %v2752_v18  ;;  %1790 = vperm.xlu1 %2201, %v1636_v60   ;;  %1785 = vperm.xlu0 %2200, %v1635_v49   ;;  %v671_v18 = vmax.f32 %v525_v45, %v607_v35  ;;  %v698_v60 = vmax.f32 %v454_v40, %v634_v62  ;;  %v637_v62 = vmul.f32 0.01, %v3068_v4 }
 0x101   :  { %v608_v1 = vmul.f32 0.01, %v415_v23  ;;  %v704_v47 = vmax.f32 %v463_v41, %v640_v54  ;;  %v567_v54 = vadd.f32 %v2851_v48, %v2773_v36  ;;  %v669_v17 = vmax.f32 %v522_v59, %v605_v5 }
 0x102   :  { %v609_v46 = vmul.f32 0.01, %v528_v6  ;;  %v766_v38 = vpack.c.bf16 %v700_v63, %v698_v60  ;;  %v3079_v48 = vadd.f32 %v2824_v22, %v2796_v0  ;;  %v667_v36 = vmax.f32 %v519_v39, %v603_v50  ;;  %v3610_v50 = vld [vmem:[#allocation46_spill] sm:$0xff] }
 0x103   :  { %v672_v43 = vmax.f32 %v415_v23, %v608_v1  ;;  %v768_v25 = vpack.c.bf16 %v704_v47, %v702_v33  ;;  %v639_v23 = vmul.f32 0.01, %v573_v20  ;;  %v664_v63 = vmax.f32 %v3009_v30, %v3051_v19  ;;  %v3604_v19 = vld [vmem:[#allocation24_spill] sm:$0xff]  ;;  %v3607_v33 = vld [vmem:[#allocation53_spill] sm:$0xff] }
 0x104   :  { %v673_v57 = vmax.f32 %v528_v6, %v609_v46  ;;  %v666_v46 = vmax.f32 %v406_v10, %v602_v53  ;;  %v696_v6 = vmax.f32 %v2998_v26, %v3037_v61  ;;  %v665_v5 = vmax.f32 %v3013_v14, %v3054_v8  ;;  %v3099_v8 = vpop.permute.xlu0 %192  ;;  %v3605_v10 = vld [vmem:[#allocation20_spill] sm:$0xff]  ;;  %v3608_v1 = vld [vmem:[#allocation45_spill] sm:$0xff] }
 0x105   :  { %v575_v41 = vpop.f32.mrf.mxu3  ;;  %1211 = vmatpush.bf16.msrb.mxu3 %v768_v25  ;;  %v752_v24 = vpack.c.bf16 %v672_v43, %v670_v51  ;;  %v635_v47 = vmul.f32 0.01, %v567_v54  ;;  %v703_v22 = vmax.f32 %v573_v20, %v639_v23  ;;  %v751_v0 = vpack.c.bf16 %v669_v17, %v667_v36  ;;  %v3609_v43 = vld [vmem:[#allocation54_spill] sm:$0xff]  ;;  %v3614_v23 = vld [vmem:[#allocation17_spill] sm:$0xff]  ;;  %v3615_v17 = vld [vmem:[#allocation27_spill] sm:$0xff] }
 0x106   :  { %v576_v29 = vadd.f32 %v575_v41, %v2775_v37  ;;  %v753_v56 = vpack.c.bf16 %v673_v57, %v671_v18  ;;  %v561_v37 = vadd.f32 %v2805_v21, %v2803_v11  ;;  %v750_v53 = vpack.c.bf16 %v668_v34, %v666_v46  ;;  %v417_v57 = vpop.f32.mrf.mxu0  ;;  %v3611_v34 = vld [vmem:[#allocation47_spill] sm:$0xff]  ;;  %v3612_v41 = vld [vmem:[#allocation38_spill] sm:$0xff] }
 0x107   :  { %1122 = vmatpush.bf16.msrb.mxu2 %v752_v24  ;;  %v3090_v35 = vadd.f32 %v2782_v42, %v2834_v31  ;;  %v3597_v11 = vmax.f32 %v2924_v27, %v2984_v52  ;;  %v662_v26 = vmax.f32 %v2988_v2, %v3028_v16  ;;  %v692_v51 = vmax.f32 %v2957_v12, %v3002_v44  ;;  %v3598_v27 = vld [vmem:[#allocation23_spill] sm:$0xff]  ;;  %v3601_v2 = vld [vmem:[#allocation48_spill] sm:$0xff]  ;;  %v3618_v46 = vld [vmem:[#allocation30_spill] sm:$0xff] }
 0x108   :  { %v641_v25 = vmul.f32 0.01, %v576_v29  ;;  %1300 = vmatpush.bf16.msrb.mxu0 %v753_v56  ;;  %1939 = vperm.xlu0 %2200, %v1936_v13   ;;  %v663_v30 = vmax.f32 %v3020_v7, %v599_v9  ;;  %v633_v14 = vmul.f32 0.01, %v3079_v48  ;;  %v701_v42 = vmax.f32 %v3068_v4, %v637_v62  ;;  %v3600_v16 = vld [vmem:[#allocation55_spill] sm:$0xff]  ;;  %v3613_v13 = vld [vmem:[#allocation34_spill] sm:$0xff] }
 0x109   :  { %1212 = vmatpush.bf16.msrb.mxu3 %v766_v38  ;;  %v764_v21 = vpack.c.bf16 %v696_v6, %v3597_v11  ;;  %v690_v52 = vmax.f32 %v2920_v3, %v2981_v28  ;;  %v555_v40 = vadd.f32 %v3599_v55, %v3598_v27  ;;  %v660_v45 = vmax.f32 %v3601_v2, %v3600_v16  ;;  %v3606_v3 = vld [vmem:[#allocation11_spill] sm:$0xff]  ;;  %v3616_v9 = vld [vmem:[#allocation37_spill] sm:$0xff]  ;;  %v3619_v6 = vld [vmem:[#allocation40_spill] sm:$0xff] }
 0x10a   :  { %v705_v39 = vmax.f32 %v576_v29, %v641_v25  ;;  %v748_v44 = vpack.c.bf16 %v664_v63, %v662_v26  ;;  %v631_v12 = vmul.f32 0.01, %v561_v37  ;;  %v699_v61 = vmax.f32 %v567_v54, %v635_v47  ;;  %v183_v25 = vpop.permute.xlu1 %182  ;;  %v3622_v47 = vld [vmem:[#allocation41_spill] sm:$0xff]  ;;  %v3625_v26 = vld [vmem:[#allocation43_spill] sm:$0xff] }
 0x10b   :  { %1123 = vmatpush.bf16.msrb.mxu2 %v750_v53  ;;  %v749_v7 = vpack.c.bf16 %v665_v5, %v663_v30  ;;  %v661_v49 = vmax.f32 %v3603_v15, %v3602_v58  ;;  %v3114_v59 = vadd.f32 %v3605_v10, %v3604_v19  ;;  %v427_v28 = vadd.f32 %v3606_v3, %v3099_v8  ;;  %v3621_v5 = vld [vmem:[#allocation49_spill] sm:$0xff]  ;;  %v3626_v30 = vld [vmem:[#allocation50_spill] sm:$0xff]  ;;  %v3630_v2 = vld [vmem:[#allocation35_spill] sm:$0xff] }
 0x10c   :  { %1301 = vmatpush.bf16.msrb.mxu0 %v751_v0  ;;  %v769_v31 = vpack.c.bf16 %v705_v39, %v703_v22  ;;  %v762_v32 = vpack.c.bf16 %v692_v51, %v690_v52  ;;  %v658_v20 = vmax.f32 %v3608_v1, %v3607_v33  ;;  %v659_v4 = vmax.f32 %v3610_v50, %v3609_v43  ;;  %v3623_v39 = vld [vmem:[#allocation21_spill] sm:$0xff]  ;;  %v3629_v52 = vld [vmem:[#allocation18_spill] sm:$0xff]  ;;  %v3637_v3 = vld [vmem:[#allocation44_spill] sm:$0xff] }
 0x10d   :  { %1213 = vmatpush.bf16.msrb.mxu3 %v764_v21  ;;  %v629_v18 = vmul.f32 0.01, %v3090_v35  ;;  %v767_v60 = vpack.c.bf16 %v701_v42, %v699_v61  ;;  %v697_v54 = vmax.f32 %v3079_v48, %v633_v14  ;;  %v656_v24 = vmax.f32 %v3612_v41, %v3611_v34  ;;  %v3624_v21 = vld [vmem:[#allocation52_spill] sm:$0xff]  ;;  %v3627_v14 = vld [vmem:[#allocation42_spill] sm:$0xff]  ;;  %v3634_v15 = vld [vmem:[#allocation25_spill] sm:$0xff] }
 0x10e   :  { %1389 = vmatpush.bf16.msrb.mxu1 %v769_v31  ;;  %v3128_v29 = vadd.f32 %v3614_v23, %v3613_v13  ;;  %v746_v56 = vpack.c.bf16 %v660_v45, %v658_v20  ;;  %v3617_v38 = vmax.f32 %v3615_v17, %v3616_v9  ;;  %v3620_v36 = vmax.f32 %v3618_v46, %v3619_v6  ;;  %v3628_v42 = vld [vmem:[#allocation32_spill] sm:$0xff]  ;;  %v3638_v1 = vld [vmem:[#allocation26_spill] sm:$0xff]  ;;  %v3639_v20 = vld [vmem:[#allocation33_spill] sm:$0xff] }
 0x10f   :  { %1124 = vmatpush.bf16.msrb.mxu2 %v748_v44  ;;  %v627_v63 = vmul.f32 0.01, %v555_v40  ;;  %v695_v53 = vmax.f32 %v561_v37, %v631_v12  ;;  %v747_v48 = vpack.c.bf16 %v661_v49, %v659_v4  ;;  %v657_v22 = vmax.f32 %v3622_v47, %v3621_v5  ;;  %v3631_v45 = vld [vmem:[#allocation16_spill] sm:$0xff]  ;;  %v3635_v49 = vld [vmem:[#allocation31_spill] sm:$0xff]  ;;  %v3642_v4 = vld [vmem:[#allocation29_spill] sm:$0xff] }
 0x110   :  { %1302 = vmatpush.bf16.msrb.mxu0 %v749_v7  ;;  %v760_v62 = vpack.c.bf16 %v3620_v36, %v3617_v38  ;;  %v616_v0 = vmul.f32 0.01, %v427_v28  ;;  %v418_v11 = vadd.f32 %v417_v57, %v3623_v39  ;;  %v682_v51 = vmax.f32 %v3625_v26, %v3624_v21  ;;  %v3632_v12 = vld [vmem:[#allocation36_spill] sm:$0xff]  ;;  %v3633_v7 = vld [vmem:[#allocation6_spill] sm:$0xff]  ;;  %v3641_v50 = vld [vmem:[#allocation39_spill] sm:$0xff] }
 0x111   :  { %1214 = vmatpush.bf16.msrb.mxu3 %v762_v32  ;;  %v684_v31 = vmax.f32 %v3627_v14, %v3626_v30  ;;  %v546_v27 = vadd.f32 %v3629_v52, %v3628_v42  ;;  %v625_v37 = vmul.f32 0.01, %v3114_v59  ;;  %v765_v55 = vpack.c.bf16 %v697_v54, %v695_v53  ;;  %v3644_v9 = vld [vmem:[#allocation28_spill] sm:$0xff]  ;;  %v2040_v21 = vld [vmem:[%s3515_s3 + $0x8] sm:$0xf0] }
 0x112   :  { %1390 = vmatpush.bf16.msrb.mxu1 %v767_v60  ;;  %v693_v16 = vmax.f32 %v3090_v35, %v629_v18  ;;  %v651_v44 = vmax.f32 %v3631_v45, %v3630_v2  ;;  %v614_v61 = vmul.f32 0.01, %v3632_v12  ;;  %v421_v58 = vadd.f32 %v3633_v7, %v183_v25  ;;  %v3645_v38 = vld [vmem:[#allocation12_spill] sm:$0xff]  ;;  %v2038_v30 = vld [vmem:[%s3515_s3] sm:$0xf]  ;;  %v3650_v42 = vld [vmem:[#allocation15_spill] sm:$0xff] }
 0x113   :  { %1125 = vmatpush.bf16.msrb.mxu2 %v746_v56  ;;  %v3636_v19 = vmax.f32 %v3634_v15, %v3635_v49  ;;  %v623_v32 = vmul.f32 0.01, %v3637_v3  ;;  %v691_v33 = vmax.f32 %v555_v40, %v627_v63  ;;  %v3640_v43 = vmax.f32 %v3638_v1, %v3639_v20  ;;  %v3647_v53 = vld [vmem:[#allocation8_spill] sm:$0xff]  ;;  %v2165_v14 = vld [vmem:[%s3515_s3 + $0x4] sm:$0xf0]  ;;  %v3651_v2 = vld [vmem:[#allocation9_spill] sm:$0xff] }
 0x114   :  { %1303 = vmatpush.bf16.msrb.mxu0 %v747_v48  ;;  %v653_v18 = vmax.f32 %v3642_v4, %v3641_v50  ;;  %v619_v57 = vmul.f32 0.01, %v3128_v29  ;;  %v610_v60 = vmul.f32 0.01, %v418_v11  ;;  %v758_v54 = vpack.c.bf16 %v684_v31, %v682_v51  ;;  %v3652_v45 = vld [vmem:[#allocation10_spill] sm:$0xff]  ;;  %v3213_v50 = vpop.permute.xlu2 %804 }
 0x115   :  { %1215 = vmatpush.bf16.msrb.mxu3 %v760_v62  ;;  %v744_v10 = vpack.c.bf16 %v656_v24, %v3636_v19  ;;  %v745_v35 = vpack.c.bf16 %v657_v22, %v3640_v43  ;;  %v680_v34 = vmax.f32 %v427_v28, %v616_v0  ;;  %v621_v41 = vmul.f32 0.01, %v546_v27  ;;  %v3643_v24 = vld [vmem:[#allocation13_spill] sm:$0xff]  ;;  %v3646_v28 = vld [vmem:[#allocation19_spill] sm:$0xff]  ;;  %v2164_v0 = vld [vmem:[%s3515_s3 + $0x4] sm:$0xf] }
 0x116   :  { %1391 = vmatpush.bf16.msrb.mxu1 %v765_v55  ;;  %v540_v13 = vadd.f32 %v3643_v24, %v3099_v8  ;;  %v763_v40 = vpack.c.bf16 %v693_v16, %v691_v33  ;;  %v689_v23 = vmax.f32 %v3114_v59, %v625_v37  ;;  %v612_v56 = vmul.f32 0.01, %v421_v58  ;;  %v2048_v15 = vld [vmem:[%s3515_s3 + $0x18] sm:$0xf0]  ;;  %v2046_v49 = vld [vmem:[%s3515_s3 + $0x10] sm:$0xf] }
 0x117   :  { %1126 = vmatpush.bf16.msrb.mxu2 %v744_v10  ;;  %v678_v17 = vmax.f32 %v3632_v12, %v614_v61  ;;  %v537_v46 = vadd.f32 %v3645_v38, %v3644_v9  ;;  %v687_v6 = vmax.f32 %v3637_v3, %v623_v32  ;;  %v743_v36 = vpack.c.bf16 %v653_v18, %v651_v44  ;;  %v2167_v19 = vld [vmem:[%s3515_s3 + $0x14] sm:$0xf0]  ;;  %v2168_v32 = vld [vmem:[%s3515_s3 + $0x24] sm:$0xf]  ;;  %v2056_v33 = vld [vmem:[%s3515_s3 + $0x28] sm:$0xf0] }
 0x118   :  { %1304 = vmatpush.bf16.msrb.mxu0 %v745_v35  ;;  %v674_v63 = vmax.f32 %v418_v11, %v610_v60  ;;  %v683_v8 = vmax.f32 %v3128_v29, %v619_v57  ;;  %v534_v48 = vadd.f32 %v3647_v53, %v183_v25  ;;  %v617_v59 = vmul.f32 0.01, %v540_v13  ;;  %v3648_v11 = vld [vmem:[#allocation7_spill] sm:$0xff]  ;;  %v3649_v25 = vld [vmem:[#allocation14_spill] sm:$0xff]  ;;  %v2170_v4 = vld [vmem:[%s3515_s3 + $0x34] sm:$0xf] }
 0x119   :  { %1216 = vmatpush.bf16.msrb.mxu3 %v758_v54  ;;  %v756_v62 = vpack.c.bf16 %v680_v34, %v678_v17  ;;  %v761_v5 = vpack.c.bf16 %v689_v23, %v687_v6  ;;  %v685_v47 = vmax.f32 %v546_v27, %v621_v41  ;;  %v676_v22 = vmax.f32 %v421_v58, %v612_v56  ;;  %v2166_v58 = vld [vmem:[%s3515_s3 + $0x14] sm:$0xf]  ;;  %v2054_v1 = vld [vmem:[%s3515_s3 + $0x20] sm:$0xf]  ;;  %v2169_v20 = vld [vmem:[%s3515_s3 + $0x24] sm:$0xf0]  ;;  %v3227_v34 = vpop.permute.xlu0 %809 }
 0x11a   :  { %1392 = vmatpush.bf16.msrb.mxu1 %v763_v40  ;;  %v531_v26 = vadd.f32 %v3648_v11, %v3623_v39  ;;  %v615_v29 = vmul.f32 0.01, %v537_v46  ;;  %v613_v31 = vmul.f32 0.01, %v534_v48  ;;  %v681_v27 = vmax.f32 %v540_v13, %v617_v59  ;;  %v2064_v18 = vld [vmem:[%s3515_s3 + $0x38] sm:$0xf0]  ;;  %v3231_v13 = vpop.permute.xlu1 %814 }
 0x11b   :  { %1127 = vmatpush.bf16.msrb.mxu2 %v3646_v28  ;;  %v754_v51 = vpack.c.bf16 %v676_v22, %v674_v63  ;;  %v759_v52 = vpack.c.bf16 %v685_v47, %v683_v8  ;;  %v2043_v37 = vor.u32 %v2164_v0, %v2040_v21  ;;  %v2039_v16 = vor.u32 %v2165_v14, %v2038_v30  ;;  %v2062_v57 = vld [vmem:[%s3515_s3 + $0x30] sm:$0xf]  ;;  %v2171_v60 = vld [vmem:[%s3515_s3 + $0x34] sm:$0xf0]  ;;  %v2172_v56 = vld [vmem:[%s3515_s3 + $0x44] sm:$0xf] }
 0x11c   :  { %1305 = vmatpush.bf16.msrb.mxu0 %v743_v36  ;;  %v611_v39 = vmul.f32 0.01, %v531_v26  ;;  %v679_v55 = vmax.f32 %v537_v46, %v615_v29  ;;  %v677_v12 = vmax.f32 %v534_v48, %v613_v31  ;;  %v2051_v10 = vor.u32 %v2166_v58, %v2048_v15  ;;  %v3229_v24 = vpop.permute.xlu2 %819  ;;  %v2072_v17 = vld [vmem:[%s3515_s3 + $0x48] sm:$0xf0]  ;;  %v2070_v38 = vld [vmem:[%s3515_s3 + $0x40] sm:$0xf] }
 0x11d   :  { %1217 = vmatpush.bf16.msrb.mxu3 %v756_v62  ;;  %v2047_v3 = vor.u32 %v2167_v19, %v2046_v49  ;;  %v2059_v43 = vor.u32 %v2168_v32, %v2056_v33  ;;  %v2055_v35 = vor.u32 %v2169_v20, %v2054_v1  ;;  %v2067_v54 = vor.u32 %v2170_v4, %v2064_v18  ;;  %v2173_v46 = vld [vmem:[%s3515_s3 + $0x44] sm:$0xf0]  ;;  %v2174_v8 = vld [vmem:[%s3515_s3 + $0x54] sm:$0xf]  ;;  %v2080_v53 = vld [vmem:[%s3515_s3 + $0x58] sm:$0xf0] }
 0x11e   :  { %1393 = vmatpush.bf16.msrb.mxu1 %v761_v5  ;;  %v757_v44 = vpack.c.bf16 %v681_v27, %v679_v55  ;;  %v675_v61 = vmax.f32 %v531_v26, %v611_v39  ;;  %v2063_v41 = vor.u32 %v2171_v60, %v2062_v57  ;;  %v2075_v6 = vor.u32 %v2172_v56, %v2072_v17  ;;  %v2078_v48 = vld [vmem:[%s3515_s3 + $0x50] sm:$0xf]  ;;  %v2175_v59 = vld [vmem:[%s3515_s3 + $0x54] sm:$0xf0]  ;;  %v2086_v30 = vld [vmem:[%s3515_s3 + $0x60] sm:$0xf] }
 0x11f   :  { %1128 = vmatpush.bf16.msrb.mxu2 %v3649_v25  ;;  %v2071_v36 = vor.u32 %v2173_v46, %v2070_v38  ;;  %v2083_v47 = vor.u32 %v2174_v8, %v2080_v53  ;;  %v2079_v21 = vor.u32 %v2175_v59, %v2078_v48  ;;  %v2176_v25 = vld [vmem:[%s3515_s3 + $0x64] sm:$0xf]  ;;  %v2177_v14 = vld [vmem:[%s3515_s3 + $0x64] sm:$0xf0]  ;;  %v2178_v39 = vld [vmem:[%s3515_s3 + $0x74] sm:$0xf] }
 0x120   :  { %1306 = vmatpush.bf16.msrb.mxu0 %v3650_v42  ;;  %v755_v7 = vpack.c.bf16 %v677_v12, %v675_v61  ;;  %v2087_v42 = vor.u32 %v2177_v14, %v2086_v30  ;;  %v2096_v55 = vld [vmem:[%s3515_s3 + $0x78] sm:$0xf0]  ;;  %v2180_v19 = vld [vmem:[%s3515_s3 + $0x84] sm:$0xf]  ;;  %v2181_v32 = vld [vmem:[%s3515_s3 + $0x84] sm:$0xf0] }
 0x121   :  { %1218 = vmatpush.bf16.msrb.mxu3 %v754_v51  ;;  %v3233_v40 = vpop.permute.xlu0 %824  ;;  %v2088_v51 = vld [vmem:[%s3515_s3 + $0x68] sm:$0xf0]  ;;  %v2099_v61 = vor.u32 %v2178_v39, %v2096_v55  ;;  %v2110_v48 = vld [vmem:[%s3515_s3 + $0x90] sm:$0xf]  ;;  %v2183_v59 = vld [vmem:[%s3515_s3 + $0x94] sm:$0xf0] }
 0x122   :  { %1394 = vmatpush.bf16.msrb.mxu1 %v759_v52  ;;  %v3243_v9 = vpop.permute.xlu1 %829  ;;  %v2091_v31 = vor.u32 %v2176_v25, %v2088_v51 }
 0x123   :  { %1129 = vmatpush.bf16.msrb.mxu2 %v3651_v2 }
 0x124   :  { %1307 = vmatpush.bf16.msrb.mxu0 %v3652_v45  ;;  %1219 = vmatmul.bf16.vlgmr.msrb.gmra.mxu3 %v2043_v37  ;;  %v3235_v23 = vpop.permute.xlu2 %834  ;;  %v2094_v45 = vld [vmem:[%s3515_s3 + $0x70] sm:$0xf] }
 0x126   :  { %1395 = vmatpush.bf16.msrb.mxu1 %v757_v44  ;;  %1130 = vmatmul.bf16.vlgmr.msrb.gmra.mxu2 %v2039_v16  ;;  %v2179_v44 = vld [vmem:[%s3515_s3 + $0x74] sm:$0xf0] }
 0x127   :  { %1308 = vmatmul.bf16.vlgmr.msrb.gmra.mxu0 %v2039_v16 }
 0x129   :  { %v3251_v28 = vpop.permute.xlu0 %839 }
 0x12a   :  { %1396 = vmatpush.bf16.msrb.mxu1 %v755_v7  ;;  %v3255_v63 = vpop.permute.xlu1 %844  ;;  %v2095_v7 = vor.u32 %v2179_v44, %v2094_v45 }
 0x12c   :  { %v3253_v62 = vpop.permute.xlu2 %849 }
 0x12d   :  { %1397 = vmatmul.bf16.vlgmr.msrb.gmra.mxu1 %v2043_v37 }
 0x131   :  { %v3269_v5 = vpop.permute.xlu0 %854 }
 0x132   :  { %v3273_v0 = vpop.permute.xlu1 %859 }
 0x134   :  { %1224 = vmatmul.bf16.gmra.mxu3 %v2051_v10  ;;  %v3271_v22 = vpop.permute.xlu2 %864 }
 0x136   :  { %1135 = vmatmul.bf16.gmra.mxu2 %v2047_v3 }
 0x137   :  { %1313 = vmatmul.bf16.gmra.mxu0 %v2047_v3  ;;  %v2102_v3 = vld [vmem:[%s3515_s3 + $0x80] sm:$0xf] }
 0x138   :  { %v2103_v20 = vor.u32 %v2181_v32, %v2102_v3 }
 0x139   :  { %v3275_v11 = vpop.permute.xlu0 %869 }
 0x13a   :  { %v3279_v29 = vpop.permute.xlu1 %874 }
 0x13c   :  { %v3277_v26 = vpop.permute.xlu2 %879 }
 0x13d   :  { %1402 = vmatmul.bf16.gmra.mxu1 %v2051_v10  ;;  %v2104_v10 = vld [vmem:[%s3515_s3 + $0x88] sm:$0xf0] }
 0x13e   :  { %v2107_v33 = vor.u32 %v2180_v19, %v2104_v10 }
 0x141   :  { %v3293_v52 = vpop.permute.xlu0 %884 }
 0x142   :  { %v3297_v37 = vpop.permute.xlu1 %889 }
 0x144   :  { %1229 = vmatmul.bf16.gmra.mxu3 %v2059_v43  ;;  %v3295_v27 = vpop.permute.xlu2 %894 }
 0x146   :  { %1140 = vmatmul.bf16.gmra.mxu2 %v2055_v35 }
 0x147   :  { %1318 = vmatmul.bf16.gmra.mxu0 %v2055_v35 }
 0x149   :  { %v3305_v16 = vpop.permute.xlu0 %899 }
 0x14a   :  { %v3315_v12 = vpop.permute.xlu1 %904 }
 0x14c   :  { %v3307_v2 = vpop.permute.xlu2 %909 }
 0x14d   :  { %1407 = vmatmul.bf16.gmra.mxu1 %v2059_v43 }
 0x151   :  { %v3317_v58 = vpop.permute.xlu0 %914 }
 0x152   :  { %v3321_v49 = vpop.permute.xlu1 %919 }
 0x154   :  { %1234 = vmatmul.bf16.gmra.mxu3 %v2067_v54  ;;  %v3319_v15 = vpop.permute.xlu2 %924 }
 0x156   :  { %1145 = vmatmul.bf16.gmra.mxu2 %v2063_v41 }
 0x157   :  { %1323 = vmatmul.bf16.gmra.mxu0 %v2063_v41 }
 0x159   :  { %v3335_v1 = vpop.permute.xlu0 %929 }
 0x15a   :  { %v3339_v35 = vpop.permute.xlu1 %934 }
 0x15c   :  { %v3337_v43 = vpop.permute.xlu2 %939 }
 0x15d   :  { %1412 = vmatmul.bf16.gmra.mxu1 %v2067_v54 }
 0x161   :  { %v3343_v17 = vpop.permute.xlu0 %944 }
 0x162   :  { %v3353_v53 = vpop.permute.xlu1 %949 }
 0x164   :  { %1239 = vmatmul.bf16.gmra.mxu3 %v2075_v6  ;;  %v3351_v8 = vpop.permute.xlu2 %954 }
 0x166   :  { %1150 = vmatmul.bf16.gmra.mxu2 %v2071_v36 }
 0x167   :  { %1328 = vmatmul.bf16.gmra.mxu0 %v2071_v36  ;;  %v2112_v36 = vld [vmem:[%s3515_s3 + $0x98] sm:$0xf0] }
 0x16d   :  { %1417 = vmatmul.bf16.gmra.mxu1 %v2075_v6  ;;  %v2182_v6 = vld [vmem:[%s3515_s3 + $0x94] sm:$0xf] }
 0x174   :  { %1244 = vmatmul.bf16.gmra.mxu3 %v2083_v47 }
 0x176   :  { %1155 = vmatmul.bf16.gmra.mxu2 %v2079_v21 }
 0x177   :  { %1333 = vmatmul.bf16.gmra.mxu0 %v2079_v21 }
 0x17d   :  { %1422 = vmatmul.bf16.gmra.mxu1 %v2083_v47  ;;  %v2115_v47 = vor.u32 %v2182_v6, %v2112_v36 }
 0x184   :  { %1249 = vmatmul.bf16.gmra.mxu3 %v2091_v31 }
 0x186   :  { %1160 = vmatmul.bf16.gmra.mxu2 %v2087_v42 }
 0x187   :  { %1338 = vmatmul.bf16.gmra.mxu0 %v2087_v42  ;;  %v2111_v42 = vor.u32 %v2183_v59, %v2110_v48 }
 0x18d   :  { %1427 = vmatmul.bf16.gmra.mxu1 %v2091_v31 }
 0x194   :  { %1254 = vmatmul.bf16.gmra.mxu3 %v2099_v61 }
 0x196   :  { %1165 = vmatmul.bf16.gmra.mxu2 %v2095_v7 }
 0x197   :  { %1343 = vmatmul.bf16.gmra.mxu0 %v2095_v7  ;;  %v3363_v7 = vpop.permute.xlu0 %959 }
 0x19d   :  { %1432 = vmatmul.bf16.gmra.mxu1 %v2099_v61 }
 0x1a4   :  { %v1309_v4 = vpop.f32.mrf.mxu0  ;;  %1259 = vmatmul.bf16.gmra.mxu3 %v2107_v33 }
 0x1a5   :  { %v1310_v57 = vadd.f32 %v1309_v4, %v3213_v50 }
 0x1a6   :  { %1170 = vmatmul.bf16.gmra.mxu2 %v2103_v20 }
 0x1a7   :  { %1348 = vmatmul.bf16.gmra.mxu0 %v2103_v20  ;;  %v1220_v18 = vpop.f32.mrf.mxu3  ;;  %v1641_v20 = vpop.permute.xlu1 %1640 }
 0x1a9   :  { %v1131_v60 = vpop.f32.mrf.mxu2 }
 0x1aa   :  { %v1132_v54 = vadd.f32 %v1131_v60, %v3213_v50  ;;  %v1398_v41 = vpop.f32.mrf.mxu1 }
 0x1ab   :  { %v1399_v56 = vadd.f32 %v1398_v41, %v1310_v57 }
 0x1ac   :  { %v1221_v38 = vadd.f32 %v1220_v18, %v1132_v54  ;;  %v1311_v46 = vpop.f32.mrf.mxu0 }
 0x1ad   :  { %1437 = vmatmul.bf16.gmra.mxu1 %v2107_v33  ;;  %v1479_v21 = vmul.f32 0.01, %v1399_v56  ;;  %v1312_v25 = vadd.f32 %v1311_v46, %v3227_v34  ;;  %v1646_v33 = vpop.permute.xlu2 %1645 }
 0x1ae   :  { %v1478_v30 = vmul.f32 0.01, %v1221_v38 }
 0x1af   :  { %v1222_v50 = vpop.f32.mrf.mxu3  ;;  %v1543_v44 = vmax.f32 %v1399_v56, %v1479_v21  ;;  %v2184_v21 = vld [vmem:[%s3515_s3 + $0xa4] sm:$0xf] }
 0x1b0   :  { %v1542_v19 = vmax.f32 %v1221_v38, %v1478_v30 }
 0x1b1   :  { %v1133_v51 = vpop.f32.mrf.mxu2 }
 0x1b2   :  { %v1134_v14 = vadd.f32 %v1133_v51, %v3227_v34  ;;  %v1400_v31 = vpop.f32.mrf.mxu1  ;;  %v1799_v34 = vmul.f32 %v1641_v20, %v1543_v44  ;;  %v1798_v54 = vmul.f32 %v1641_v20, %v1542_v19 }
 0x1b3   :  { %v1401_v39 = vadd.f32 %v1400_v31, %v1312_v25  ;;  %v2120_v25 = vld [vmem:[%s3515_s3 + $0xa8] sm:$0xf0]  ;;  %v2185_v31 = vld [vmem:[%s3515_s3 + $0xa4] sm:$0xf0] }
 0x1b4   :  { %v1223_v55 = vadd.f32 %v1222_v50, %v1134_v14  ;;  %v1314_v45 = vpop.f32.mrf.mxu0  ;;  %1264 = vmatmul.bf16.gmra.mxu3 %v2115_v47 }
 0x1b5   :  { %v1481_v61 = vmul.f32 0.01, %v1401_v39  ;;  %v1315_v57 = vadd.f32 %v1314_v45, %v3231_v13 }
 0x1b6   :  { %v1480_v10 = vmul.f32 0.01, %v1223_v55  ;;  %1175 = vmatmul.bf16.gmra.mxu2 %v2111_v42 }
 0x1b7   :  { %v1545_v3 = vmax.f32 %v1401_v39, %v1481_v61  ;;  %1353 = vmatmul.bf16.gmra.mxu0 %v2111_v42  ;;  %v1225_v32 = vpop.f32.mrf.mxu3  ;;  %v2123_v39 = vor.u32 %v2184_v21, %v2120_v25 }
 0x1b8   :  { %v1544_v4 = vmax.f32 %v1223_v55, %v1480_v10 }
 0x1b9   :  { %v1801_v18 = vmul.f32 %v1646_v33, %v1545_v3  ;;  %v1136_v60 = vpop.f32.mrf.mxu2 }
 0x1ba   :  { %v1800_v41 = vmul.f32 %v1646_v33, %v1544_v4  ;;  %v1137_v56 = vadd.f32 %v1136_v60, %v3231_v13  ;;  %v1403_v46 = vpop.f32.mrf.mxu1  ;;  %v2118_v13 = vld [vmem:[%s3515_s3 + $0xa0] sm:$0xf] }
 0x1bb   :  { %v1899_v6 = vadd.f32 %v1801_v18, %v1799_v34  ;;  %v1404_v38 = vadd.f32 %v1403_v46, %v1315_v57  ;;  %v2119_v3 = vor.u32 %v2185_v31, %v2118_v13  ;;  %v2128_v13 = vld [vmem:[%s3515_s3 + $0xb8] sm:$0xf0] }
 0x1bc   :  { %v1862_v36 = vadd.f32 %v1800_v41, %v1798_v54  ;;  %v1226_v50 = vadd.f32 %v1225_v32, %v1137_v56  ;;  %v1316_v48 = vpop.f32.mrf.mxu0  ;;  %v1656_v41 = vpop.permute.xlu1 %1655 }
 0x1bd   :  { %v1483_v59 = vmul.f32 0.01, %v1404_v38  ;;  %1442 = vmatmul.bf16.gmra.mxu1 %v2115_v47  ;;  %v1651_v47 = vpop.permute.xlu0 %1650  ;;  %v1317_v45 = vadd.f32 %v1316_v48, %v3229_v24 }
 0x1be   :  { %v1482_v51 = vmul.f32 0.01, %v1226_v50 }
 0x1bf   :  { %v1547_v30 = vmax.f32 %v1404_v38, %v1483_v59  ;;  %v1227_v14 = vpop.f32.mrf.mxu3 }
 0x1c0   :  { %v1546_v42 = vmax.f32 %v1226_v50, %v1482_v51 }
 0x1c1   :  { %v1803_v55 = vmul.f32 %v1651_v47, %v1547_v30  ;;  %v1138_v44 = vpop.f32.mrf.mxu2 }
 0x1c2   :  { %v1802_v61 = vmul.f32 %v1651_v47, %v1546_v42  ;;  %v1139_v19 = vadd.f32 %v1138_v44, %v3229_v24  ;;  %v1405_v10 = vpop.f32.mrf.mxu1 }
 0x1c3   :  { %v1900_v32 = vadd.f32 %v1899_v6, %v1803_v55  ;;  %v1406_v33 = vadd.f32 %v1405_v10, %v1317_v45  ;;  %v2187_v55 = vld [vmem:[%s3515_s3 + $0xb4] sm:$0xf0] }
 0x1c4   :  { %v1863_v20 = vadd.f32 %v1862_v36, %v1802_v61  ;;  %v1228_v4 = vadd.f32 %v1227_v14, %v1139_v19  ;;  %v1319_v34 = vpop.f32.mrf.mxu0  ;;  %1269 = vmatmul.bf16.gmra.mxu3 %v2123_v39  ;;  %v2186_v14 = vld [vmem:[%s3515_s3 + $0xb4] sm:$0xf] }
 0x1c5   :  { %v1485_v18 = vmul.f32 0.01, %v1406_v33  ;;  %v1320_v38 = vadd.f32 %v1319_v34, %v3233_v40  ;;  %v2131_v44 = vor.u32 %v2186_v14, %v2128_v13 }
 0x1c6   :  { %v1484_v57 = vmul.f32 0.01, %v1228_v4  ;;  %1180 = vmatmul.bf16.gmra.mxu2 %v2119_v3 }
 0x1c7   :  { %v1549_v60 = vmax.f32 %v1406_v33, %v1485_v18  ;;  %1358 = vmatmul.bf16.gmra.mxu0 %v2119_v3  ;;  %v1230_v54 = vpop.f32.mrf.mxu3 }
 0x1c8   :  { %v1548_v56 = vmax.f32 %v1228_v4, %v1484_v57 }
 0x1c9   :  { %v1805_v46 = vmul.f32 %v1656_v41, %v1549_v60  ;;  %v1141_v24 = vpop.f32.mrf.mxu2 }
 0x1ca   :  { %v1804_v50 = vmul.f32 %v1656_v41, %v1548_v56  ;;  %v1142_v6 = vadd.f32 %v1141_v24, %v3233_v40  ;;  %v1408_v48 = vpop.f32.mrf.mxu1  ;;  %v2126_v40 = vld [vmem:[%s3515_s3 + $0xb0] sm:$0xf] }
 0x1cb   :  { %v1901_v36 = vadd.f32 %v1900_v32, %v1805_v46  ;;  %v1409_v59 = vadd.f32 %v1408_v48, %v1320_v38  ;;  %v1666_v38 = vpop.permute.xlu0 %1665 }
 0x1cc   :  { %v1864_v21 = vadd.f32 %v1863_v20, %v1804_v50  ;;  %v1231_v25 = vadd.f32 %v1230_v54, %v1142_v6  ;;  %v1321_v51 = vpop.f32.mrf.mxu0  ;;  %v2127_v20 = vor.u32 %v2187_v55, %v2126_v40 }
 0x1cd   :  { %v1487_v30 = vmul.f32 0.01, %v1409_v59  ;;  %1447 = vmatmul.bf16.gmra.mxu1 %v2123_v39  ;;  %v1661_v39 = vpop.permute.xlu2 %1660  ;;  %v1322_v19 = vadd.f32 %v1321_v51, %v3243_v9 }
 0x1ce   :  { %v1486_v31 = vmul.f32 0.01, %v1231_v25 }
 0x1cf   :  { %v1551_v47 = vmax.f32 %v1409_v59, %v1487_v30  ;;  %v1232_v42 = vpop.f32.mrf.mxu3 }
 0x1d0   :  { %v1550_v45 = vmax.f32 %v1231_v25, %v1486_v31  ;;  %v2188_v31 = vld [vmem:[%s3515_s3 + $0xc4] sm:$0xf] }
 0x1d1   :  { %v1807_v61 = vmul.f32 %v1661_v39, %v1551_v47  ;;  %v1143_v10 = vpop.f32.mrf.mxu2  ;;  %v2136_v47 = vld [vmem:[%s3515_s3 + $0xc8] sm:$0xf0] }
 0x1d2   :  { %v1806_v3 = vmul.f32 %v1661_v39, %v1550_v45  ;;  %v1144_v32 = vadd.f32 %v1143_v10, %v3243_v9  ;;  %v1410_v33 = vpop.f32.mrf.mxu1  ;;  %v2189_v39 = vld [vmem:[%s3515_s3 + $0xc4] sm:$0xf0]  ;;  %v1671_v45 = vpop.permute.xlu1 %1670 }
 0x1d3   :  { %v1902_v4 = vadd.f32 %v1901_v36, %v1807_v61  ;;  %v1411_v34 = vadd.f32 %v1410_v33, %v1322_v19  ;;  %v2139_v61 = vor.u32 %v2188_v31, %v2136_v47  ;;  %v2190_v31 = vld [vmem:[%s3515_s3 + $0xd4] sm:$0xf]  ;;  %v2144_v47 = vld [vmem:[%s3515_s3 + $0xd8] sm:$0xf0] }
 0x1d4   :  { %v1865_v18 = vadd.f32 %v1864_v21, %v1806_v3  ;;  %v1233_v57 = vadd.f32 %v1232_v42, %v1144_v32  ;;  %v1324_v60 = vpop.f32.mrf.mxu0  ;;  %1274 = vmatmul.bf16.gmra.mxu3 %v2131_v44 }
 0x1d5   :  { %v1489_v54 = vmul.f32 0.01, %v1411_v34  ;;  %v1325_v6 = vadd.f32 %v1324_v60, %v3235_v23 }
 0x1d6   :  { %v1488_v41 = vmul.f32 0.01, %v1233_v57  ;;  %1185 = vmatmul.bf16.gmra.mxu2 %v2127_v20 }
 0x1d7   :  { %v1553_v56 = vmax.f32 %v1411_v34, %v1489_v54  ;;  %1363 = vmatmul.bf16.gmra.mxu0 %v2127_v20  ;;  %v1235_v46 = vpop.f32.mrf.mxu3 }
 0x1d8   :  { %v1552_v24 = vmax.f32 %v1233_v57, %v1488_v41 }
 0x1d9   :  { %v1809_v50 = vmul.f32 %v1666_v38, %v1553_v56  ;;  %v1146_v9 = vpop.f32.mrf.mxu2 }
 0x1da   :  { %v1808_v48 = vmul.f32 %v1666_v38, %v1552_v24  ;;  %v1147_v36 = vadd.f32 %v1146_v9, %v3235_v23  ;;  %v1413_v59 = vpop.f32.mrf.mxu1  ;;  %v2134_v23 = vld [vmem:[%s3515_s3 + $0xc0] sm:$0xf]  ;;  %v1676_v24 = vpop.permute.xlu2 %1675 }
 0x1db   :  { %v1903_v21 = vadd.f32 %v1902_v4, %v1809_v50  ;;  %v1414_v25 = vadd.f32 %v1413_v59, %v1325_v6  ;;  %v2135_v4 = vor.u32 %v2189_v39, %v2134_v23  ;;  %v2191_v23 = vld [vmem:[%s3515_s3 + $0xd4] sm:$0xf0]  ;;  %v1681_v39 = vpop.permute.xlu0 %1680 }
 0x1dc   :  { %v1866_v51 = vadd.f32 %v1865_v18, %v1808_v48  ;;  %v1236_v30 = vadd.f32 %v1235_v46, %v1147_v36  ;;  %v1326_v14 = vpop.f32.mrf.mxu0 }
 0x1dd   :  { %v1491_v13 = vmul.f32 0.01, %v1414_v25  ;;  %1452 = vmatmul.bf16.gmra.mxu1 %v2131_v44  ;;  %v1327_v10 = vadd.f32 %v1326_v14, %v3251_v28 }
 0x1de   :  { %v1490_v42 = vmul.f32 0.01, %v1236_v30 }
 0x1df   :  { %v1555_v40 = vmax.f32 %v1414_v25, %v1491_v13  ;;  %v1237_v55 = vpop.f32.mrf.mxu3 }
 0x1e0   :  { %v1554_v44 = vmax.f32 %v1236_v30, %v1490_v42 }
 0x1e1   :  { %v1811_v19 = vmul.f32 %v1671_v45, %v1555_v40  ;;  %v1148_v3 = vpop.f32.mrf.mxu2 }
 0x1e2   :  { %v1810_v32 = vmul.f32 %v1671_v45, %v1554_v44  ;;  %v1149_v33 = vadd.f32 %v1148_v3, %v3251_v28  ;;  %v1415_v20 = vpop.f32.mrf.mxu1  ;;  %v2147_v44 = vor.u32 %v2190_v31, %v2144_v47 }
 0x1e3   :  { %v1904_v34 = vadd.f32 %v1903_v21, %v1811_v19  ;;  %v1416_v18 = vadd.f32 %v1415_v20, %v1327_v10 }
 0x1e4   :  { %v1867_v57 = vadd.f32 %v1866_v51, %v1810_v32  ;;  %v1238_v60 = vadd.f32 %v1237_v55, %v1149_v33  ;;  %v1329_v54 = vpop.f32.mrf.mxu0  ;;  %1279 = vmatmul.bf16.gmra.mxu3 %v2139_v61 }
 0x1e5   :  { %v1493_v41 = vmul.f32 0.01, %v1416_v18  ;;  %v1330_v9 = vadd.f32 %v1329_v54, %v3255_v63 }
 0x1e6   :  { %v1492_v56 = vmul.f32 0.01, %v1238_v60  ;;  %1190 = vmatmul.bf16.gmra.mxu2 %v2135_v4 }
 0x1e7   :  { %v1557_v46 = vmax.f32 %v1416_v18, %v1493_v41  ;;  %1368 = vmatmul.bf16.gmra.mxu0 %v2135_v4  ;;  %v1240_v38 = vpop.f32.mrf.mxu3 }
 0x1e8   :  { %v1556_v50 = vmax.f32 %v1238_v60, %v1492_v56 }
 0x1e9   :  { %v1813_v6 = vmul.f32 %v1676_v24, %v1557_v46  ;;  %v1151_v28 = vpop.f32.mrf.mxu2 }
 0x1ea   :  { %v1812_v48 = vmul.f32 %v1676_v24, %v1556_v50  ;;  %v1152_v36 = vadd.f32 %v1151_v28, %v3255_v63  ;;  %v1418_v59 = vpop.f32.mrf.mxu1  ;;  %v2142_v63 = vld [vmem:[%s3515_s3 + $0xd0] sm:$0xf] }
 0x1eb   :  { %v1905_v21 = vadd.f32 %v1904_v34, %v1813_v6  ;;  %v1419_v25 = vadd.f32 %v1418_v59, %v1330_v9  ;;  %v2143_v20 = vor.u32 %v2191_v23, %v2142_v63 }
 0x1ec   :  { %v1868_v51 = vadd.f32 %v1867_v57, %v1812_v48  ;;  %v1241_v30 = vadd.f32 %v1240_v38, %v1152_v36  ;;  %v1331_v14 = vpop.f32.mrf.mxu0  ;;  %v1686_v38 = vpop.permute.xlu1 %1685 }
 0x1ed   :  { %v1495_v13 = vmul.f32 0.01, %v1419_v25  ;;  %1457 = vmatmul.bf16.gmra.mxu1 %v2139_v61  ;;  %v1332_v19 = vadd.f32 %v1331_v14, %v3253_v62  ;;  %v2192_v14 = vld [vmem:[%s3515_s3 + $0xe4] sm:$0xf] }
 0x1ee   :  { %v1494_v42 = vmul.f32 0.01, %v1241_v30 }
 0x1ef   :  { %v1559_v40 = vmax.f32 %v1419_v25, %v1495_v13  ;;  %v1242_v55 = vpop.f32.mrf.mxu3  ;;  %v2152_v13 = vld [vmem:[%s3515_s3 + $0xe8] sm:$0xf0] }
 0x1f0   :  { %v1558_v45 = vmax.f32 %v1241_v30, %v1494_v42  ;;  %v2155_v23 = vor.u32 %v2192_v14, %v2152_v13  ;;  %v2195_v13 = vld [vmem:[%s3515_s3 + $0xf4] sm:$0xf0] }
 0x1f1   :  { %v1815_v61 = vmul.f32 %v1681_v39, %v1559_v40  ;;  %v1153_v10 = vpop.f32.mrf.mxu2  ;;  %v2193_v40 = vld [vmem:[%s3515_s3 + $0xe4] sm:$0xf0] }
 0x1f2   :  { %v1814_v3 = vmul.f32 %v1681_v39, %v1558_v45  ;;  %v1154_v32 = vadd.f32 %v1153_v10, %v3253_v62  ;;  %v1420_v33 = vpop.f32.mrf.mxu1 }
 0x1f3   :  { %v1906_v4 = vadd.f32 %v1905_v21, %v1815_v61  ;;  %v1421_v34 = vadd.f32 %v1420_v33, %v1332_v19 }
 0x1f4   :  { %v1869_v18 = vadd.f32 %v1868_v51, %v1814_v3  ;;  %v1243_v57 = vadd.f32 %v1242_v55, %v1154_v32  ;;  %v1334_v60 = vpop.f32.mrf.mxu0  ;;  %1284 = vmatmul.bf16.gmra.mxu3 %v2147_v44  ;;  %v1691_v55 = vpop.permute.xlu2 %1690 }
 0x1f5   :  { %v1497_v54 = vmul.f32 0.01, %v1421_v34  ;;  %v1335_v6 = vadd.f32 %v1334_v60, %v3269_v5 }
 0x1f6   :  { %v1496_v41 = vmul.f32 0.01, %v1243_v57  ;;  %1195 = vmatmul.bf16.gmra.mxu2 %v2143_v20 }
 0x1f7   :  { %v1561_v56 = vmax.f32 %v1421_v34, %v1497_v54  ;;  %1373 = vmatmul.bf16.gmra.mxu0 %v2143_v20  ;;  %v1245_v46 = vpop.f32.mrf.mxu3 }
 0x1f8   :  { %v1560_v24 = vmax.f32 %v1243_v57, %v1496_v41  ;;  %v1696_v41 = vpop.permute.xlu0 %1695 }
 0x1f9   :  { %v1817_v50 = vmul.f32 %v1686_v38, %v1561_v56  ;;  %v1156_v62 = vpop.f32.mrf.mxu2 }
 0x1fa   :  { %v1816_v9 = vmul.f32 %v1686_v38, %v1560_v24  ;;  %v1157_v28 = vadd.f32 %v1156_v62, %v3269_v5  ;;  %v1423_v48 = vpop.f32.mrf.mxu1  ;;  %v2150_v5 = vld [vmem:[%s3515_s3 + $0xe0] sm:$0xf] }
 0x1fb   :  { %v1907_v36 = vadd.f32 %v1906_v4, %v1817_v50  ;;  %v1424_v59 = vadd.f32 %v1423_v48, %v1335_v6  ;;  %v2151_v3 = vor.u32 %v2193_v40, %v2150_v5 }
 0x1fc   :  { %v1870_v21 = vadd.f32 %v1869_v18, %v1816_v9  ;;  %v1246_v25 = vadd.f32 %v1245_v46, %v1157_v28  ;;  %v1336_v51 = vpop.f32.mrf.mxu0 }
 0x1fd   :  { %v1499_v30 = vmul.f32 0.01, %v1424_v59  ;;  %1462 = vmatmul.bf16.gmra.mxu1 %v2147_v44  ;;  %v1337_v45 = vadd.f32 %v1336_v51, %v3273_v0 }
 0x1fe   :  { %v1498_v31 = vmul.f32 0.01, %v1246_v25 }
 0x1ff   :  { %v1563_v47 = vmax.f32 %v1424_v59, %v1499_v30  ;;  %v1247_v42 = vpop.f32.mrf.mxu3 }
 0x200   :  { %v1562_v63 = vmax.f32 %v1246_v25, %v1498_v31  ;;  %v2160_v25 = vld [vmem:[%s3515_s3 + $0xf8] sm:$0xf0]  ;;  %v1701_v31 = vpop.permute.xlu1 %1700 }
 0x201   :  { %v1819_v39 = vmul.f32 %v1691_v55, %v1563_v47  ;;  %v1158_v44 = vpop.f32.mrf.mxu2 }
 0x202   :  { %v1818_v61 = vmul.f32 %v1691_v55, %v1562_v63  ;;  %v1159_v19 = vadd.f32 %v1158_v44, %v3273_v0  ;;  %v1425_v10 = vpop.f32.mrf.mxu1 }
 0x203   :  { %v1908_v32 = vadd.f32 %v1907_v36, %v1819_v39  ;;  %v1426_v33 = vadd.f32 %v1425_v10, %v1337_v45 }
 0x204   :  { %v1871_v20 = vadd.f32 %v1870_v21, %v1818_v61  ;;  %v1248_v4 = vadd.f32 %v1247_v42, %v1159_v19  ;;  %v1339_v34 = vpop.f32.mrf.mxu0  ;;  %1289 = vmatmul.bf16.gmra.mxu3 %v2155_v23  ;;  %v2194_v21 = vld [vmem:[%s3515_s3 + $0xf4] sm:$0xf] }
 0x205   :  { %v1501_v18 = vmul.f32 0.01, %v1426_v33  ;;  %v1340_v38 = vadd.f32 %v1339_v34, %v3271_v22  ;;  %v2163_v42 = vor.u32 %v2194_v21, %v2160_v25  ;;  %v1706_v34 = vpop.permute.xlu2 %1705 }
 0x206   :  { %v1500_v57 = vmul.f32 0.01, %v1248_v4  ;;  %1200 = vmatmul.bf16.gmra.mxu2 %v2151_v3 }
 0x207   :  { %v1565_v60 = vmax.f32 %v1426_v33, %v1501_v18  ;;  %1378 = vmatmul.bf16.gmra.mxu0 %v2151_v3  ;;  %v1250_v54 = vpop.f32.mrf.mxu3 }
 0x208   :  { %v1564_v56 = vmax.f32 %v1248_v4, %v1500_v57 }
 0x209   :  { %v1821_v46 = vmul.f32 %v1696_v41, %v1565_v60  ;;  %v1161_v0 = vpop.f32.mrf.mxu2 }
 0x20a   :  { %v1820_v24 = vmul.f32 %v1696_v41, %v1564_v56  ;;  %v1162_v50 = vadd.f32 %v1161_v0, %v3271_v22  ;;  %v1428_v6 = vpop.f32.mrf.mxu1  ;;  %v2158_v22 = vld [vmem:[%s3515_s3 + $0xf0] sm:$0xf]  ;;  %s2230_s3 = smov [#allocation3]  }
 0x20b   :  { %v1909_v62 = vadd.f32 %v1908_v32, %v1821_v46  ;;  %v1429_v9 = vadd.f32 %v1428_v6, %v1340_v38  ;;  %v2159_v45 = vor.u32 %v2195_v13, %v2158_v22  ;;  %s1961_s10 = sshll.u32 %s2230_s3, 4  ;;  %s1962_s10 = int_to_ptr.vmem [resolvable:$true] %s1961_s10 }
 0x20c   :  { %v1872_v28 = vadd.f32 %v1871_v20, %v1820_v24  ;;  %v1251_v48 = vadd.f32 %v1250_v54, %v1162_v50  ;;  %v1341_v36 = vpop.f32.mrf.mxu0 }
 0x20d   :  { %v1503_v59 = vmul.f32 0.01, %v1429_v9  ;;  %1467 = vmatmul.bf16.gmra.mxu1 %v2155_v23  ;;  %v1342_v40 = vadd.f32 %v1341_v36, %v3275_v11 }
 0x20e   :  { %v1502_v51 = vmul.f32 0.01, %v1251_v48 }
 0x20f   :  { %v1567_v30 = vmax.f32 %v1429_v9, %v1503_v59  ;;  %v1252_v14 = vpop.f32.mrf.mxu3 }
 0x210   :  { %v1566_v47 = vmax.f32 %v1251_v48, %v1502_v51  ;;  %v1711_v48 = vpop.permute.xlu0 %1710 }
 0x211   :  { %v1823_v5 = vmul.f32 %v1701_v31, %v1567_v30  ;;  %v1163_v55 = vpop.f32.mrf.mxu2 }
 0x212   :  { %v1822_v63 = vmul.f32 %v1701_v31, %v1566_v47  ;;  %v1164_v23 = vadd.f32 %v1163_v55, %v3275_v11  ;;  %v1430_v39 = vpop.f32.mrf.mxu1 }
 0x213   :  { %v1910_v44 = vadd.f32 %v1909_v62, %v1823_v5  ;;  %v1431_v61 = vadd.f32 %v1430_v39, %v1342_v40 }
 0x214   :  { %v1873_v19 = vadd.f32 %v1872_v28, %v1822_v63  ;;  %v1253_v10 = vadd.f32 %v1252_v14, %v1164_v23  ;;  %v1344_v3 = vpop.f32.mrf.mxu0  ;;  %1294 = vmatmul.bf16.gmra.mxu3 %v2163_v42  ;;  %v1716_v63 = vpop.permute.xlu1 %1715 }
 0x215   :  { %v1505_v32 = vmul.f32 0.01, %v1431_v61  ;;  %v1345_v60 = vadd.f32 %v1344_v3, %v3279_v29 }
 0x216   :  { %v1504_v33 = vmul.f32 0.01, %v1253_v10  ;;  %1205 = vmatmul.bf16.gmra.mxu2 %v2159_v45 }
 0x217   :  { %v1569_v20 = vmax.f32 %v1431_v61, %v1505_v32  ;;  %1383 = vmatmul.bf16.gmra.mxu0 %v2159_v45  ;;  %v1255_v4 = vpop.f32.mrf.mxu3 }
 0x218   :  { %v1568_v18 = vmax.f32 %v1253_v10, %v1504_v33 }
 0x219   :  { %v1825_v57 = vmul.f32 %v1706_v34, %v1569_v20  ;;  %v1166_v11 = vpop.f32.mrf.mxu2 }
 0x21a   :  { %v1824_v54 = vmul.f32 %v1706_v34, %v1568_v18  ;;  %v1167_v41 = vadd.f32 %v1166_v11, %v3279_v29  ;;  %v1433_v56 = vpop.f32.mrf.mxu1 }
 0x21b   :  { %v1911_v46 = vadd.f32 %v1910_v44, %v1825_v57  ;;  %v1434_v38 = vadd.f32 %v1433_v56, %v1345_v60  ;;  %v1721_v60 = vpop.permute.xlu2 %1720 }
 0x21c   :  { %v1874_v0 = vadd.f32 %v1873_v19, %v1824_v54  ;;  %v1256_v24 = vadd.f32 %v1255_v4, %v1167_v41  ;;  %v1346_v50 = vpop.f32.mrf.mxu0 }
 0x21d   :  { %v1507_v6 = vmul.f32 0.01, %v1434_v38  ;;  %1472 = vmatmul.bf16.gmra.mxu1 %v2163_v42  ;;  %v1347_v21 = vadd.f32 %v1346_v50, %v3277_v26 }
 0x21e   :  { %v1506_v62 = vmul.f32 0.01, %v1256_v24 }
 0x21f   :  { %v1571_v9 = vmax.f32 %v1434_v38, %v1507_v6  ;;  %v1257_v28 = vpop.f32.mrf.mxu3 }
 0x220   :  { %v1570_v36 = vmax.f32 %v1256_v24, %v1506_v62 }
 0x221   :  { %v1827_v59 = vmul.f32 %v1711_v48, %v1571_v9  ;;  %v1168_v25 = vpop.f32.mrf.mxu2 }
 0x222   :  { %v1826_v51 = vmul.f32 %v1711_v48, %v1570_v36  ;;  %v1169_v29 = vadd.f32 %v1168_v25, %v3277_v26  ;;  %v1435_v30 = vpop.f32.mrf.mxu1 }
 0x223   :  { %v1912_v14 = vadd.f32 %v1911_v46, %v1827_v59  ;;  %v1436_v22 = vadd.f32 %v1435_v30, %v1347_v21  ;;  %v1726_v59 = vpop.permute.xlu0 %1725 }
 0x224   :  { %v1875_v13 = vadd.f32 %v1874_v0, %v1826_v51  ;;  %v1258_v31 = vadd.f32 %v1257_v28, %v1169_v29  ;;  %v1349_v47 = vpop.f32.mrf.mxu0 }
 0x225   :  { %v1509_v5 = vmul.f32 0.01, %v1436_v22  ;;  %v1350_v45 = vadd.f32 %v1349_v47, %v3293_v52 }
 0x226   :  { %v1508_v42 = vmul.f32 0.01, %v1258_v31 }
 0x227   :  { %v1573_v40 = vmax.f32 %v1436_v22, %v1509_v5  ;;  %v1260_v55 = vpop.f32.mrf.mxu3 }
 0x228   :  { %v1572_v23 = vmax.f32 %v1258_v31, %v1508_v42 }
 0x229   :  { %v1829_v39 = vmul.f32 %v1716_v63, %v1573_v40  ;;  %v1171_v44 = vpop.f32.mrf.mxu2 }
 0x22a   :  { %v1828_v61 = vmul.f32 %v1716_v63, %v1572_v23  ;;  %v1172_v19 = vadd.f32 %v1171_v44, %v3293_v52  ;;  %v1438_v26 = vpop.f32.mrf.mxu1  ;;  %v1731_v23 = vpop.permute.xlu1 %1730 }
 0x22b   :  { %v1913_v10 = vadd.f32 %v1912_v14, %v1829_v39  ;;  %v1439_v3 = vadd.f32 %v1438_v26, %v1350_v45 }
 0x22c   :  { %v1876_v32 = vadd.f32 %v1875_v13, %v1828_v61  ;;  %v1261_v33 = vadd.f32 %v1260_v55, %v1172_v19  ;;  %v1351_v20 = vpop.f32.mrf.mxu0 }
 0x22d   :  { %v1511_v4 = vmul.f32 0.01, %v1439_v3  ;;  %v1352_v41 = vadd.f32 %v1351_v20, %v3297_v37 }
 0x22e   :  { %v1510_v34 = vmul.f32 0.01, %v1261_v33 }
 0x22f   :  { %v1575_v18 = vmax.f32 %v1439_v3, %v1511_v4  ;;  %v1262_v57 = vpop.f32.mrf.mxu3 }
 0x230   :  { %v1574_v11 = vmax.f32 %v1261_v33, %v1510_v34 }
 0x231   :  { %v1831_v54 = vmul.f32 %v1721_v60, %v1575_v18  ;;  %v1173_v56 = vpop.f32.mrf.mxu2 }
 0x232   :  { %v1830_v46 = vmul.f32 %v1721_v60, %v1574_v11  ;;  %v1174_v38 = vadd.f32 %v1173_v56, %v3297_v37  ;;  %v1440_v52 = vpop.f32.mrf.mxu1  ;;  %v1736_v60 = vpop.permute.xlu2 %1735 }
 0x233   :  { %v1914_v0 = vadd.f32 %v1913_v10, %v1831_v54  ;;  %v1441_v24 = vadd.f32 %v1440_v52, %v1352_v41 }
 0x234   :  { %v1877_v50 = vadd.f32 %v1876_v32, %v1830_v46  ;;  %v1263_v6 = vadd.f32 %v1262_v57, %v1174_v38  ;;  %v1354_v62 = vpop.f32.mrf.mxu0 }
 0x235   :  { %v1513_v9 = vmul.f32 0.01, %v1441_v24  ;;  %v1355_v51 = vadd.f32 %v1354_v62, %v3295_v27 }
 0x236   :  { %v1512_v28 = vmul.f32 0.01, %v1263_v6 }
 0x237   :  { %v1577_v48 = vmax.f32 %v1441_v24, %v1513_v9  ;;  %v1265_v36 = vpop.f32.mrf.mxu3 }
 0x238   :  { %v1576_v21 = vmax.f32 %v1263_v6, %v1512_v28 }
 0x239   :  { %v1833_v25 = vmul.f32 %v1726_v59, %v1577_v48  ;;  %v1176_v29 = vpop.f32.mrf.mxu2 }
 0x23a   :  { %v1832_v30 = vmul.f32 %v1726_v59, %v1576_v21  ;;  %v1177_v14 = vadd.f32 %v1176_v29, %v3295_v27  ;;  %v1443_v37 = vpop.f32.mrf.mxu1 }
 0x23b   :  { %v1915_v22 = vadd.f32 %v1914_v0, %v1833_v25  ;;  %v1444_v13 = vadd.f32 %v1443_v37, %v1355_v51 }
 0x23c   :  { %v1878_v31 = vadd.f32 %v1877_v50, %v1832_v30  ;;  %v1266_v47 = vadd.f32 %v1265_v36, %v1177_v14  ;;  %v1356_v5 = vpop.f32.mrf.mxu0  ;;  %v1741_v36 = vpop.permute.xlu0 %1740 }
 0x23d   :  { %v1515_v42 = vmul.f32 0.01, %v1444_v13  ;;  %v1357_v44 = vadd.f32 %v1356_v5, %v3305_v16 }
 0x23e   :  { %v1514_v40 = vmul.f32 0.01, %v1266_v47 }
 0x23f   :  { %v1579_v55 = vmax.f32 %v1444_v13, %v1515_v42  ;;  %v1267_v63 = vpop.f32.mrf.mxu3 }
 0x240   :  { %v1578_v39 = vmax.f32 %v1266_v47, %v1514_v40 }
 0x241   :  { %v1835_v45 = vmul.f32 %v1731_v23, %v1579_v55  ;;  %v1178_v61 = vpop.f32.mrf.mxu2 }
 0x242   :  { %v1834_v19 = vmul.f32 %v1731_v23, %v1578_v39  ;;  %v1179_v26 = vadd.f32 %v1178_v61, %v3305_v16  ;;  %v1445_v27 = vpop.f32.mrf.mxu1 }
 0x243   :  { %v1916_v10 = vadd.f32 %v1915_v22, %v1835_v45  ;;  %v1446_v3 = vadd.f32 %v1445_v27, %v1357_v44 }
 0x244   :  { %v1879_v32 = vadd.f32 %v1878_v31, %v1834_v19  ;;  %v1268_v33 = vadd.f32 %v1267_v63, %v1179_v26  ;;  %v1359_v20 = vpop.f32.mrf.mxu0 }
 0x245   :  { %v1517_v4 = vmul.f32 0.01, %v1446_v3  ;;  %v1360_v41 = vadd.f32 %v1359_v20, %v3315_v12 }
 0x246   :  { %v1516_v34 = vmul.f32 0.01, %v1268_v33 }
 0x247   :  { %v1581_v18 = vmax.f32 %v1446_v3, %v1517_v4  ;;  %v1270_v57 = vpop.f32.mrf.mxu3 }
 0x248   :  { %v1580_v11 = vmax.f32 %v1268_v33, %v1516_v34 }
 0x249   :  { %v1837_v54 = vmul.f32 %v1736_v60, %v1581_v18  ;;  %v1181_v56 = vpop.f32.mrf.mxu2 }
 0x24a   :  { %v1836_v46 = vmul.f32 %v1736_v60, %v1580_v11  ;;  %v1182_v38 = vadd.f32 %v1181_v56, %v3315_v12  ;;  %v1448_v16 = vpop.f32.mrf.mxu1 }
 0x24b   :  { %v1917_v52 = vadd.f32 %v1916_v10, %v1837_v54  ;;  %v1449_v0 = vadd.f32 %v1448_v16, %v1360_v41 }
 0x24c   :  { %v1880_v24 = vadd.f32 %v1879_v32, %v1836_v46  ;;  %v1271_v50 = vadd.f32 %v1270_v57, %v1182_v38  ;;  %v1361_v6 = vpop.f32.mrf.mxu0 }
 0x24d   :  { %v1519_v62 = vmul.f32 0.01, %v1449_v0  ;;  %v1362_v33 = vadd.f32 %v1361_v6, %v3307_v2 }
 0x24e   :  { %v1518_v9 = vmul.f32 0.01, %v1271_v50 }
 0x24f   :  { %v1583_v28 = vmax.f32 %v1449_v0, %v1519_v62  ;;  %v1272_v48 = vpop.f32.mrf.mxu3 }
 0x250   :  { %v1582_v59 = vmax.f32 %v1271_v50, %v1518_v9 }
 0x251   :  { %v1839_v21 = vmul.f32 %v1741_v36, %v1583_v28  ;;  %v1183_v25 = vpop.f32.mrf.mxu2 }
 0x252   :  { %v1838_v51 = vmul.f32 %v1741_v36, %v1582_v59  ;;  %v1450_v29 = vpop.f32.mrf.mxu1  ;;  %v1184_v3 = vadd.f32 %v1183_v25, %v3307_v2  ;;  %v1746_v2 = vpop.permute.xlu1 %1745 }
 0x253   :  { %v3475_v30 = vadd.f32 %v1917_v52, %v1839_v21  ;;  %v1451_v20 = vadd.f32 %v1450_v29, %v1362_v33 }
 0x254   :  { %v3477_v14 = vadd.f32 %v1880_v24, %v1838_v51  ;;  %v1364_v12 = vpop.f32.mrf.mxu0  ;;  %v1273_v34 = vadd.f32 %v1272_v48, %v1184_v3  ;;  %v1751_v48 = vpop.permute.xlu2 %1750 }
 0x255   :  { %v1365_v18 = vadd.f32 %v1364_v12, %v3317_v58  ;;  %v1521_v41 = vmul.f32 0.01, %v1451_v20 }
 0x256   :  { %v1520_v56 = vmul.f32 0.01, %v1273_v34 }
 0x257   :  { %v1275_v37 = vpop.f32.mrf.mxu3  ;;  %v1585_v24 = vmax.f32 %v1451_v20, %v1521_v41 }
 0x258   :  { %v1584_v62 = vmax.f32 %v1273_v34, %v1520_v56 }
 0x259   :  { %v1186_v22 = vpop.f32.mrf.mxu2  ;;  %v1841_v25 = vmul.f32 %v1746_v2, %v1585_v24 }
 0x25a   :  { %v1453_v13 = vpop.f32.mrf.mxu1  ;;  %v1187_v57 = vadd.f32 %v1186_v22, %v3317_v58  ;;  %v1840_v12 = vmul.f32 %v1746_v2, %v1584_v62 }
 0x25b   :  { %v1454_v11 = vadd.f32 %v1453_v13, %v1365_v18  ;;  %v1761_v18 = vpop.permute.xlu1 %1760 }
 0x25c   :  { %v1366_v31 = vpop.f32.mrf.mxu0  ;;  %v1276_v16 = vadd.f32 %v1275_v37, %v1187_v57 }
 0x25d   :  { %v1367_v52 = vadd.f32 %v1366_v31, %v3321_v49  ;;  %v1523_v0 = vmul.f32 0.01, %v1454_v11 }
 0x25e   :  { %v1522_v28 = vmul.f32 0.01, %v1276_v16 }
 0x25f   :  { %v1277_v47 = vpop.f32.mrf.mxu3  ;;  %v1587_v36 = vmax.f32 %v1454_v11, %v1523_v0 }
 0x260   :  { %v1586_v13 = vmax.f32 %v1276_v16, %v1522_v28 }
 0x261   :  { %v1188_v5 = vpop.f32.mrf.mxu2 }
 0x262   :  { %v1455_v42 = vpop.f32.mrf.mxu1  ;;  %v1189_v46 = vadd.f32 %v1188_v5, %v3321_v49  ;;  %v1756_v5 = vpop.permute.xlu0 %1755 }
 0x263   :  { %v1456_v50 = vadd.f32 %v1455_v42, %v1367_v52  ;;  %v1843_v42 = vmul.f32 %v1751_v48, %v1587_v36  ;;  %v1766_v52 = vpop.permute.xlu2 %1765 }
 0x264   :  { %v1369_v40 = vpop.f32.mrf.mxu0  ;;  %v1278_v9 = vadd.f32 %v1277_v47, %v1189_v46 }
 0x265   :  { %v1525_v51 = vmul.f32 0.01, %v1456_v50  ;;  %v1370_v29 = vadd.f32 %v1369_v40, %v3319_v15 }
 0x266   :  { %v1524_v49 = vmul.f32 0.01, %v1278_v9 }
 0x267   :  { %v1280_v55 = vpop.f32.mrf.mxu3  ;;  %v1589_v20 = vmax.f32 %v1456_v50, %v1525_v51 }
 0x268   :  { %v1588_v57 = vmax.f32 %v1278_v9, %v1524_v49 }
 0x269   :  { %v1191_v63 = vpop.f32.mrf.mxu2  ;;  %v1845_v46 = vmul.f32 %v1756_v5, %v1589_v20 }
 0x26a   :  { %v1458_v23 = vpop.f32.mrf.mxu1  ;;  %v1192_v59 = vadd.f32 %v1191_v63, %v3319_v15  ;;  %v1919_v63 = vadd.f32 %v3475_v30, %v1841_v25  ;;  %v1771_v36 = vpop.permute.xlu0 %1770 }
 0x26b   :  { %v1459_v31 = vadd.f32 %v1458_v23, %v1370_v29 }
 0x26c   :  { %v1371_v39 = vpop.f32.mrf.mxu0  ;;  %v1281_v3 = vadd.f32 %v1280_v55, %v1192_v59  ;;  %v1920_v56 = vadd.f32 %v1919_v63, %v1843_v42 }
 0x26d   :  { %v1372_v47 = vadd.f32 %v1371_v39, %v3335_v1  ;;  %v1527_v39 = vmul.f32 0.01, %v1459_v31 }
 0x26e   :  { %v1526_v30 = vmul.f32 0.01, %v1281_v3 }
 0x26f   :  { %v1282_v45 = vpop.f32.mrf.mxu3  ;;  %v1591_v0 = vmax.f32 %v1459_v31, %v1527_v39 }
 0x270   :  { %v1590_v9 = vmax.f32 %v1281_v3, %v1526_v30 }
 0x271   :  { %v1193_v44 = vpop.f32.mrf.mxu2  ;;  %v1847_v29 = vmul.f32 %v1761_v18, %v1591_v0 }
 0x272   :  { %v1460_v61 = vpop.f32.mrf.mxu1  ;;  %v1194_v37 = vadd.f32 %v1193_v44, %v3335_v1  ;;  %v1882_v44 = vadd.f32 %v3477_v14, %v1840_v12  ;;  %v1842_v1 = vmul.f32 %v1751_v48, %v1586_v13  ;;  %v1846_v13 = vmul.f32 %v1761_v18, %v1590_v9 }
 0x273   :  { %v1461_v34 = vadd.f32 %v1460_v61, %v1372_v47 }
 0x274   :  { %v1374_v19 = vpop.f32.mrf.mxu0  ;;  %v1283_v11 = vadd.f32 %v1282_v45, %v1194_v37  ;;  %v1883_v62 = vadd.f32 %v1882_v44, %v1842_v1  ;;  %v1781_v1 = vpop.permute.xlu2 %1780 }
 0x275   :  { %v1375_v15 = vadd.f32 %v1374_v19, %v3339_v35  ;;  %v1529_v16 = vmul.f32 0.01, %v1461_v34 }
 0x276   :  { %v1528_v2 = vmul.f32 0.01, %v1283_v11 }
 0x277   :  { %v3479_v26 = vpop.f32.mrf.mxu3  ;;  %v1593_v48 = vmax.f32 %v1461_v34, %v1529_v16 }
 0x278   :  { %v1592_v25 = vmax.f32 %v1283_v11, %v1528_v2 }
 0x279   :  { %v1196_v27 = vpop.f32.mrf.mxu2  ;;  %v1849_v42 = vmul.f32 %v1766_v52, %v1593_v48 }
 0x27a   :  { %v1463_v10 = vpop.f32.mrf.mxu1  ;;  %v1197_v33 = vadd.f32 %v1196_v27, %v3339_v35  ;;  %v1848_v20 = vmul.f32 %v1766_v52, %v1592_v25 }
 0x27b   :  { %v1464_v41 = vadd.f32 %v1463_v10, %v1375_v15 }
 0x27c   :  { %v1376_v32 = vpop.f32.mrf.mxu0  ;;  %v1286_v61 = vadd.f32 %v3479_v26, %v1197_v33 }
 0x27d   :  { %v1377_v55 = vadd.f32 %v1376_v32, %v3337_v43  ;;  %v1531_v24 = vmul.f32 0.01, %v1464_v41 }
 0x27e   :  { %v1530_v28 = vmul.f32 0.01, %v1286_v61 }
 0x27f   :  { %v3483_v4 = vpop.f32.mrf.mxu3  ;;  %v1595_v12 = vmax.f32 %v1464_v41, %v1531_v24 }
 0x280   :  { %v1594_v31 = vmax.f32 %v1286_v61, %v1530_v28 }
 0x281   :  { %v1198_v60 = vpop.f32.mrf.mxu2 }
 0x282   :  { %v1465_v54 = vpop.f32.mrf.mxu1  ;;  %v1199_v23 = vadd.f32 %v1198_v60, %v3337_v43  ;;  %v1844_v60 = vmul.f32 %v1756_v5, %v1588_v57  ;;  %v1851_v57 = vmul.f32 %v1771_v36, %v1595_v12  ;;  %v1850_v18 = vmul.f32 %v1771_v36, %v1594_v31 }
 0x283   :  { %v1466_v14 = vadd.f32 %v1465_v54, %v1377_v55  ;;  %v1921_v54 = vadd.f32 %v1920_v56, %v1845_v46 }
 0x284   :  { %v1379_v38 = vpop.f32.mrf.mxu0  ;;  %v1288_v10 = vadd.f32 %v3483_v4, %v1199_v23  ;;  %v1884_v59 = vadd.f32 %v1883_v62, %v1844_v60  ;;  %v1786_v60 = vpop.permute.xlu0 %1785 }
 0x285   :  { %v1380_v45 = vadd.f32 %v1379_v38, %v3343_v17  ;;  %v1922_v44 = vadd.f32 %v1921_v54, %v1847_v29  ;;  %v1796_v29 = vpop.permute.xlu2 %1795 }
 0x286   :  { %v1532_v4 = vmul.f32 0.01, %v1288_v10  ;;  %v1885_v39 = vadd.f32 %v1884_v59, %v1846_v13 }
 0x287   :  { %v1290_v6 = vpop.f32.mrf.mxu3 }
 0x288   :  { %v1596_v34 = vmax.f32 %v1288_v10, %v1532_v4  ;;  %v1886_v61 = vadd.f32 %v1885_v39, %v1848_v20 }
 0x289   :  { %v1201_v58 = vpop.f32.mrf.mxu2 }
 0x28a   :  { %v1468_v21 = vpop.f32.mrf.mxu1  ;;  %v1202_v35 = vadd.f32 %v1201_v58, %v3343_v17  ;;  %v1533_v17 = vmul.f32 0.01, %v1466_v14  ;;  %v1887_v2 = vadd.f32 %v1886_v61, %v1850_v18 }
 0x28b   :  { %v1469_v50 = vadd.f32 %v1468_v21, %v1380_v45 }
 0x28c   :  { %v1381_v22 = vpop.f32.mrf.mxu0  ;;  %v1291_v58 = vadd.f32 %v1290_v6, %v1202_v35  ;;  %v1597_v3 = vmax.f32 %v1466_v14, %v1533_v17 }
 0x28d   :  { %v1382_v26 = vadd.f32 %v1381_v22, %v3353_v53  ;;  %v1535_v49 = vmul.f32 0.01, %v1469_v50  ;;  %v1776_v22 = vpop.permute.xlu1 %1775 }
 0x28e   :  { %v1534_v6 = vmul.f32 0.01, %v1291_v58  ;;  %v1853_v56 = vmul.f32 %v1776_v22, %v1597_v3  ;;  %v1852_v35 = vmul.f32 %v1776_v22, %v1596_v34 }
 0x28f   :  { %v1292_v40 = vpop.f32.mrf.mxu3  ;;  %v1599_v11 = vmax.f32 %v1469_v50, %v1535_v49 }
 0x290   :  { %v1598_v41 = vmax.f32 %v1291_v58, %v1534_v6  ;;  %v1888_v28 = vadd.f32 %v1887_v2, %v1852_v35 }
 0x291   :  { %v1203_v27 = vpop.f32.mrf.mxu2  ;;  %v1855_v16 = vmul.f32 %v1781_v1, %v1599_v11 }
 0x292   :  { %v1470_v19 = vpop.f32.mrf.mxu1  ;;  %v1204_v43 = vadd.f32 %v1203_v27, %v3353_v53  ;;  %v1854_v10 = vmul.f32 %v1781_v1, %v1598_v41 }
 0x293   :  { %v1471_v38 = vadd.f32 %v1470_v19, %v1382_v26 }
 0x294   :  { %v1384_v32 = vpop.f32.mrf.mxu0  ;;  %v1293_v51 = vadd.f32 %v1292_v40, %v1204_v43  ;;  %v1889_v36 = vadd.f32 %v1888_v28, %v1854_v10 }
 0x295   :  { %v1385_v21 = vadd.f32 %v1384_v32, %v3351_v8  ;;  %v1537_v33 = vmul.f32 0.01, %v1471_v38  ;;  %v1791_v9 = vpop.permute.xlu1 %1790 }
 0x296   :  { %v1536_v15 = vmul.f32 0.01, %v1293_v51 }
 0x297   :  { %v1295_v53 = vpop.f32.mrf.mxu3  ;;  %v1601_v30 = vmax.f32 %v1471_v38, %v1537_v33 }
 0x298   :  { %v1600_v19 = vmax.f32 %v1293_v51, %v1536_v15 }
 0x299   :  { %v1206_v37 = vpop.f32.mrf.mxu2  ;;  %v1857_v50 = vmul.f32 %v1786_v60, %v1601_v30 }
 0x29a   :  { %v1207_v47 = vadd.f32 %v1206_v37, %v3351_v8  ;;  %v1473_v5 = vpop.f32.mrf.mxu1  ;;  %v1923_v8 = vadd.f32 %v1922_v44, %v1849_v42  ;;  %v1856_v58 = vmul.f32 %v1786_v60, %v1600_v19 }
 0x29b   :  { %v1474_v63 = vadd.f32 %v1473_v5, %v1385_v21 }
 0x29c   :  { %v1296_v40 = vadd.f32 %v1295_v53, %v1207_v47  ;;  %v1386_v27 = vpop.f32.mrf.mxu0  ;;  %v1924_v46 = vadd.f32 %v1923_v8, %v1851_v57  ;;  %v1890_v12 = vadd.f32 %v1889_v36, %v1856_v58  ;;  %v1951_v57 = vlaneseq }
 0x29d   :  { %v1539_v23 = vmul.f32 0.01, %v1474_v63  ;;  %v1387_v45 = vadd.f32 %v1386_v27, %v3363_v7 }
 0x29e   :  { %v1538_v55 = vmul.f32 0.01, %v1296_v40  ;;  %v1925_v24 = vadd.f32 %v1924_v46, %v1853_v56  ;;  %vm1953_vm2 = vcmp.lt.s32.totalorder %v1951_v57, 256 }
 0x29f   :  { %v1603_v14 = vmax.f32 %v1474_v63, %v1539_v23  ;;  %v1297_v62 = vpop.f32.mrf.mxu3  ;;  %v1940_v63 = vpop.permute.xlu0 %1939 }
 0x2a0   :  { %v1602_v43 = vmax.f32 %v1296_v40, %v1538_v55  ;;  %v1926_v48 = vadd.f32 %v1925_v24, %v1855_v16  ;;  %v1942_v40 = vperm.slane %v1940_v63, 0 }
 0x2a1   :  { %v1208_v52 = vpop.f32.mrf.mxu2  ;;  %v1859_v17 = vmul.f32 %v1791_v9, %v1603_v14 }
 0x2a2   :  { %v1209_v32 = vadd.f32 %v1208_v52, %v3363_v7  ;;  %v1475_v0 = vpop.f32.mrf.mxu1  ;;  %v1858_v59 = vmul.f32 %v1791_v9, %v1602_v43  ;;  %v1927_v4 = vadd.f32 %v1926_v48, %v1857_v50 }
 0x2a3   :  { %v1476_v26 = vadd.f32 %v1475_v0, %v1387_v45 }
 0x2a4   :  { %v1298_v54 = vadd.f32 %v1297_v62, %v1209_v32  ;;  %v1928_v49 = vadd.f32 %v1927_v4, %v1859_v17  ;;  %v1891_v37 = vadd.f32 %v1890_v12, %v1858_v59 }
 0x2a5   :  { %v1541_v38 = vmul.f32 0.01, %v1476_v26 }
 0x2a6   :  { %v1540_v25 = vmul.f32 0.01, %v1298_v54 }
 0x2a7   :  { %v1605_v51 = vmax.f32 %v1476_v26, %v1541_v38 }
 0x2a8   :  { %v1604_v7 = vmax.f32 %v1298_v54, %v1540_v25 }
 0x2a9   :  { %v1861_v21 = vmul.f32 %v1796_v29, %v1605_v51 }
 0x2aa   :  { %v1860_v53 = vmul.f32 %v1796_v29, %v1604_v7 }
 0x2ab   :  { %v1929_v22 = vadd.f32 %v1928_v49, %v1861_v21 }
 0x2ac   :  { %v1892_v13 = vadd.f32 %v1891_v37, %v1860_v53 }
 0x2ad   :  { %v1930_v31 = vrot.slane %v1929_v22, 4 }
 0x2ae   :  { %v1893_v6 = vrot.slane %v1892_v13, 4 }
 0x2af   :  { %v1931_v47 = vadd.f32 %v1930_v31, %v1929_v22 }
 0x2b0   :  { %v1894_v5 = vadd.f32 %v1893_v6, %v1892_v13 }
 0x2b1   :  { %v1932_v42 = vrot.slane %v1931_v47, 2 }
 0x2b2   :  { %v1895_v3 = vrot.slane %v1894_v5, 2 }
 0x2b3   :  { %v1933_v33 = vadd.f32 %v1932_v42, %v1931_v47 }
 0x2b4   :  { %v1896_v20 = vadd.f32 %v1895_v3, %v1894_v5 }
 0x2b5   :  { %v1934_v34 = vrot.slane %v1933_v33, 1 }
 0x2b6   :  { %v1897_v15 = vrot.slane %v1896_v20, 1 }
 0x2b7   :  { %v1935_v44 = vadd.f32 %v1934_v34, %v1933_v33 }
 0x2b8   :  { %v1898_v11 = vadd.f32 %v1897_v15, %v1896_v20 }
 0x2b9   :  { %v1944_v23 = vadd.f32 %v1942_v40, %v1935_v44 }
 0x2ba   :  { %v1943_v1 = vadd.f32 %v1942_v40, %v1898_v11 }
 0x2bb   :  { %v1947_v39 = vrot.slane %v1944_v23, 7 }
 0x2bd   :  { %v1949_v18 = vsel %vm1948_vm1, %v1943_v1, %v1947_v39 }
 0x2be   :  { %1955 = vst.msk [vmem:[#allocation3] sm:$0x3] %vm1953_vm2, %v1949_v18 }
 0x2bf   :  { %1966 = dma.vmem_to_hbm [thread:$0]  %s1962_s10, 32, %s1964_s12, [#allocation4]  }
 0x2c0   :  { %2227 = dma.done.wait [#allocation4], 32  }
 0x2c1   :  { %2228 = vsyncadd [#allocation4], 4294967264 }
 0x2c2   :  { %1971 = vsyncpa [#allocation4], 1 }

</bundles_post_ra>
